<compile_context>
chip_gen: v5e
topology: v5e:2x2
jax: 0.10.0
libtpu: 0.0.40
codegen_flags: <defaults>
</compile_context>

<pallas_src>
import functools

import numpy as np
import jax
import jax.numpy as jnp
from jax import lax
from jax.experimental import pallas as pl
from jax.experimental.pallas import tpu as pltpu


def _layer_geometry(L0, C0, channels, kernels, strides, padding):
    """Static per-layer shapes: (K, stride, pad, L_in, L_out, C_in, C_out)."""
    cfgs = []
    L_in, C_in = L0, C0
    for C_out, K, s, p in zip(channels, kernels, strides, padding):
        L_out = (L_in - K + 2 * p) // s + 1
        assert 0 < L_out <= L_in, "folded-row layout assumes L_out <= L_in"
        cfgs.append((K, s, p, L_in, L_out, C_in, C_out))
        L_in, C_in = L_out, C_out
    return cfgs


def _tap_masks(K, p, L_in, tile_b):
    """0/1 validity masks for rolled taps (zero padding + batch-element boundaries)."""
    M = tile_b * L_in
    pos = np.arange(M) % L_in
    m = np.zeros((K, M, 1), np.float32)
    for k in range(K):
        src = pos + k - p
        m[k, :, 0] = ((src >= 0) & (src < L_in)).astype(np.float32)
    return m


def _row_decimation(s, L_in, L_out, tile_b):
    """0/1 matrix mapping dense row b*L_in + s*l -> output row b*L_out + l."""
    M_out, M_in = tile_b * L_out, tile_b * L_in
    d = np.zeros((M_out, M_in), np.float32)
    r = np.arange(M_out)
    d[r, (r // L_out) * L_in + s * (r % L_out)] = 1.0
    return d


def _flatten_mats(L_last, C_last, tile_b):
    """Row-select R[l] and column-place P[l] so flat[b, c*L+l] = y[b*L+l, c] (NCW)."""
    n_flat = L_last * C_last
    R = np.zeros((L_last, tile_b, tile_b * L_last), np.float32)
    P = np.zeros((L_last, C_last, n_flat), np.float32)
    for l in range(L_last):
        R[l, np.arange(tile_b), np.arange(tile_b) * L_last + l] = 1.0
        P[l, np.arange(C_last), np.arange(C_last) * L_last + l] = 1.0
    return R, P


def _build_encoder_kernel(cfgs, tile_b, L_last, C_last, n_flat):
    """Fused [Conv1d+ReLU]*N + Flatten body; one TILE_B batch slab per grid step."""

    def kernel(*refs):
        idx = 0
        x_ref = refs[idx]; idx += 1
        per_layer = []
        for (K, s, p, L_in, L_out, C_in, C_out) in cfgs:
            w_ref, b_ref, m_ref = refs[idx], refs[idx + 1], refs[idx + 2]
            idx += 3
            d_ref = None
            if s != 1 or L_out != L_in:
                d_ref = refs[idx]; idx += 1
            per_layer.append((w_ref, b_ref, m_ref, d_ref))
        r_ref, place_ref, o_ref = refs[idx], refs[idx + 1], refs[idx + 2]

        x = x_ref[...].astype(jnp.float32)                 # (TILE_B*L0, C0)
        for (K, s, p, L_in, L_out, C_in, C_out), (w_ref, b_ref, m_ref, d_ref) \
                in zip(cfgs, per_layer):
            M_in = tile_b * L_in
            acc = jnp.zeros((M_in, C_out), jnp.float32)
            for k in range(K):                             # K tiny -> static unroll
                off = k - p                                # source-row offset of tap k
                if off == 0:
                    tap = x                                # center tap: identity, no mask
                else:
                    # XLU sublane rotate brings row (j+off) to row j; the hoisted 0/1
                    # mask zeroes rows whose source is in the zero padding or would
                    # wrap across a batch-element boundary.
                    tap = pltpu.roll(x, shift=(-off) % M_in, axis=0) * m_ref[k]
                acc = acc + jnp.dot(tap, w_ref[k],
                                    preferred_element_type=jnp.float32)
            if d_ref is not None:                          # stride / length decimation
                acc = jnp.dot(d_ref[...], acc, preferred_element_type=jnp.float32)
            x = jnp.maximum(acc + b_ref[...], 0.0)         # bias + ReLU

        # Flatten (TILE_B*L_last, C_last) -> (TILE_B, C_last*L_last) in PyTorch NCW
        # order, emitted lane-dense via hoisted row-select / column-place matmuls.
        flat = jnp.zeros((tile_b, n_flat), jnp.float32)
        for l in range(L_last):                            # static unroll (L_last small)
            rows = jnp.dot(r_ref[l], x, preferred_element_type=jnp.float32)
            flat = flat + jnp.dot(rows, place_ref[l],
                                  preferred_element_type=jnp.float32)
        o_ref[...] = flat.astype(o_ref.dtype)

    return kernel


def conv1d_encoder_forward(params, obs, kernels, strides, padding,
                           flatten=True, channels_last=True, tile_b=8):
    """Matches Conv1dEncoder.forward: permute -> [Conv1d, ReLU]* -> Flatten."""
    assert tile_b % 8 == 0, "tile_b must be a multiple of 8 (sublane-dense stores)"
    if channels_last:
        B, L0, C0 = obs.shape
        x = obs                                            # kernel is channels-last inside
    else:
        B, C0, L0 = obs.shape
        x = jnp.transpose(obs, (0, 2, 1))

    channels = [w.shape[0] for (w, _) in params]
    cfgs = _layer_geometry(L0, C0, channels, kernels, strides, padding)
    L_last, C_last = cfgs[-1][4], cfgs[-1][6]
    n_flat = C_last * L_last

    # Pad batch to a multiple of TILE_B and fold it into the matmul row dimension.
    B_pad = ((B + tile_b - 1) // tile_b) * tile_b
    if B_pad != B:
        x = jnp.concatenate([x, jnp.zeros((B_pad - B, L0, C0), x.dtype)], axis=0)
    x2d = x.reshape(B_pad * L0, C0)                        # contiguous -> free reshape

    kernel_inputs = [x2d]
    in_specs = [pl.BlockSpec((tile_b * L0, C0), lambda i: (i, 0))]

    for (w, b), (K, s, p, L_in, L_out, C_in, C_out) in zip(params, cfgs):
        # Hoisted once-per-call repacking & constants (resident across grid steps).
        w_t = jnp.transpose(w, (2, 1, 0)).astype(jnp.float32)     # (K, C_in, C_out)
        b_r = b.reshape(1, C_out).astype(jnp.float32)
        kernel_inputs += [w_t, b_r, jnp.asarray(_tap_masks(K, p, L_in, tile_b))]
        in_specs += [
            pl.BlockSpec((K, C_in, C_out), lambda i: (0, 0, 0)),
            pl.BlockSpec((1, C_out), lambda i: (0, 0)),
            pl.BlockSpec((K, tile_b * L_in, 1), lambda i: (0, 0, 0)),
        ]
        if s != 1 or L_out != L_in:
            kernel_inputs.append(jnp.asarray(_row_decimation(s, L_in, L_out, tile_b)))
            in_specs.append(
                pl.BlockSpec((tile_b * L_out, tile_b * L_in), lambda i: (0, 0)))

    R, P = _flatten_mats(L_last, C_last, tile_b)
    kernel_inputs += [jnp.asarray(R), jnp.asarray(P)]
    in_specs += [
        pl.BlockSpec((L_last, tile_b, tile_b * L_last), lambda i: (0, 0, 0)),
        pl.BlockSpec((L_last, C_last, n_flat), lambda i: (0, 0, 0)),
    ]

    out = pl.pallas_call(
        _build_encoder_kernel(cfgs, tile_b, L_last, C_last, n_flat),
        out_shape=jax.ShapeDtypeStruct((B_pad, n_flat), jnp.float32),
        grid=(B_pad // tile_b,),
        in_specs=in_specs,
        out_specs=pl.BlockSpec((tile_b, n_flat), lambda i: (i, 0)),
        compiler_params=pltpu.CompilerParams(
            dimension_semantics=("parallel",)),   # v7x: shards grid steps across 2 TCs
    )(*kernel_inputs)

    out = out[:B]
    if flatten:
        return out
    return out.reshape(B, C_last, L_last)                  # flat order is already (C, L)


def init_params(key, in_channels, channels, kernels):
    # TODO(synk): PyTorch module uses ortho_init_; here we use deterministic
    # scaled-normal init (synthetic weights, not a checkpoint load).
    ch = [in_channels] + list(channels)
    keys = jax.random.split(key, 2 * len(channels))
    params = []
    for i in range(len(channels)):
        w = 0.1 * jax.random.normal(keys[2 * i], (ch[i + 1], ch[i], kernels[i]),
                                    jnp.float32)
        b = 0.1 * jax.random.normal(keys[2 * i + 1], (ch[i + 1],), jnp.float32)
        params.append((w, b))
    return params


if __name__ == "__main__":
    # Module config (small): input_shape=(L=16, C=4), channels_last=True
    B = 2
    L, C_in = 16, 4
    channels = [8, 16]
    kernels = [3, 3]
    strides = [1, 2]
    padding = [1, 1]

    root = jax.random.PRNGKey(0)
    k_params, k_obs = jax.random.split(root)
    params = init_params(k_params, C_in, channels, kernels)
    obs = jax.random.normal(k_obs, (B, L, C_in), jnp.float32)   # channels-last

    fwd = jax.jit(functools.partial(conv1d_encoder_forward,
                                    kernels=kernels, strides=strides,
                                    padding=padding))
    out = jax.block_until_ready(fwd(params, obs))

    # Pure-JAX reference (lax conv) for sanity.
    x = jnp.transpose(obs, (0, 2, 1))
    for (w, b), kk, s, p in zip(params, kernels, strides, padding):
        x = lax.conv_general_dilated(
            x, w, window_strides=(s,), padding=[(p, p)],
            dimension_numbers=("NCH", "OIH", "NCH"))
        x = jnp.maximum(x + b[None, :, None], 0.0)
    ref = x.reshape(B, -1)

    # L1: (16-3+2)//1+1 = 16 ; L2: (16-3+2)//2+1 = 8 ; flat = 16*8 = 128
    assert out.shape == (B, channels[-1] * 8), out.shape
    assert jnp.allclose(out, ref, atol=1e-4, rtol=1e-4), \
        float(jnp.max(jnp.abs(out - ref)))
    print("KERNEL_OK")
</pallas_src>

<mosaic_0001>
module attributes {stable_mosaic.version = 11 : i64} {
  func.func @kernel(%arg0: i32, %arg1: memref<128x4xf32, #tpu.memory_space<vmem>>, %arg2: memref<3x4x8xf32, #tpu.memory_space<vmem>>, %arg3: memref<1x8xf32, #tpu.memory_space<vmem>>, %arg4: memref<3x128x1xf32, #tpu.memory_space<vmem>>, %arg5: memref<3x8x16xf32, #tpu.memory_space<vmem>>, %arg6: memref<1x16xf32, #tpu.memory_space<vmem>>, %arg7: memref<3x128x1xf32, #tpu.memory_space<vmem>>, %arg8: memref<64x128xf32, #tpu.memory_space<vmem>>, %arg9: memref<8x8x64xf32, #tpu.memory_space<vmem>>, %arg10: memref<8x16x128xf32, #tpu.memory_space<vmem>>, %arg11: memref<8x128xf32, #tpu.memory_space<vmem>>) attributes {dimension_semantics = [#tpu.dimension_semantics<parallel>], iteration_bounds = array<i64: 1>, scalar_prefetch = 0 : i64, scratch_operands = 0 : i64, tpu.core_type = #tpu.core_type<tc>, window_params = [{transform_indices = @transform_0, window_bounds = array<i64: 128, 4>}, {pipeline_mode = #tpu.pipeline_mode<synchronous>, transform_indices = @transform_1, window_bounds = array<i64: 3, 4, 8>}, {pipeline_mode = #tpu.pipeline_mode<synchronous>, transform_indices = @transform_2, window_bounds = array<i64: 1, 8>}, {pipeline_mode = #tpu.pipeline_mode<synchronous>, transform_indices = @transform_3, window_bounds = array<i64: 3, 128, 1>}, {pipeline_mode = #tpu.pipeline_mode<synchronous>, transform_indices = @transform_4, window_bounds = array<i64: 3, 8, 16>}, {pipeline_mode = #tpu.pipeline_mode<synchronous>, transform_indices = @transform_5, window_bounds = array<i64: 1, 16>}, {pipeline_mode = #tpu.pipeline_mode<synchronous>, transform_indices = @transform_6, window_bounds = array<i64: 3, 128, 1>}, {pipeline_mode = #tpu.pipeline_mode<synchronous>, transform_indices = @transform_7, window_bounds = array<i64: 64, 128>}, {pipeline_mode = #tpu.pipeline_mode<synchronous>, transform_indices = @transform_8, window_bounds = array<i64: 8, 8, 64>}, {pipeline_mode = #tpu.pipeline_mode<synchronous>, transform_indices = @transform_9, window_bounds = array<i64: 8, 16, 128>}, {transform_indices = @transform_10, window_bounds = array<i64: 8, 128>}]} {
    %c0 = arith.constant 0 : index
    %c0_0 = arith.constant 0 : index
    %0 = vector.load %arg1[%c0, %c0_0] : memref<128x4xf32, #tpu.memory_space<vmem>>, vector<128x4xf32>
    %cst = arith.constant 0.000000e+00 : f32
    %1 = vector.broadcast %cst : f32 to vector<128x8xf32>
    %c1_i32 = arith.constant 1 : i32
    %2 = tpu.dynamic_rotate %0 by %c1_i32 dim 0 : vector<128x4xf32>, i32 -> vector<128x4xf32>
    %c0_1 = arith.constant 0 : index
    %c0_2 = arith.constant 0 : index
    %c0_3 = arith.constant 0 : index
    %3 = vector.load %arg4[%c0_1, %c0_2, %c0_3] : memref<3x128x1xf32, #tpu.memory_space<vmem>>, vector<1x128x1xf32>
    %4 = vector.shape_cast %3 : vector<1x128x1xf32> to vector<128x1xf32>
    %5 = vector.broadcast %4 : vector<128x1xf32> to vector<128x4xf32>
    %6 = arith.mulf %2, %5 : vector<128x4xf32>
    %c0_4 = arith.constant 0 : index
    %c0_5 = arith.constant 0 : index
    %c0_6 = arith.constant 0 : index
    %7 = vector.load %arg2[%c0_4, %c0_5, %c0_6] : memref<3x4x8xf32, #tpu.memory_space<vmem>>, vector<1x4x8xf32>
    %8 = vector.shape_cast %7 : vector<1x4x8xf32> to vector<4x8xf32>
    %cst_7 = arith.constant dense<0.000000e+00> : vector<128x8xf32>
    %9 = tpu.matmul %6, %8, %cst_7 {dimension_numbers = #tpu.dot_dimension_numbers<[1], [0], [0], [1], [0, 0, 1, 1], [], []>} : vector<128x4xf32>, vector<4x8xf32>, vector<128x8xf32> -> vector<128x8xf32>
    %10 = arith.addf %1, %9 : vector<128x8xf32>
    %c1 = arith.constant 1 : index
    %c0_8 = arith.constant 0 : index
    %c0_9 = arith.constant 0 : index
    %11 = vector.load %arg2[%c1, %c0_8, %c0_9] : memref<3x4x8xf32, #tpu.memory_space<vmem>>, vector<1x4x8xf32>
    %12 = vector.shape_cast %11 : vector<1x4x8xf32> to vector<4x8xf32>
    %cst_10 = arith.constant dense<0.000000e+00> : vector<128x8xf32>
    %13 = tpu.matmul %0, %12, %cst_10 {dimension_numbers = #tpu.dot_dimension_numbers<[1], [0], [0], [1], [0, 0, 1, 1], [], []>} : vector<128x4xf32>, vector<4x8xf32>, vector<128x8xf32> -> vector<128x8xf32>
    %14 = arith.addf %10, %13 : vector<128x8xf32>
    %c127_i32 = arith.constant 127 : i32
    %15 = tpu.dynamic_rotate %0 by %c127_i32 dim 0 : vector<128x4xf32>, i32 -> vector<128x4xf32>
    %c2 = arith.constant 2 : index
    %c0_11 = arith.constant 0 : index
    %c0_12 = arith.constant 0 : index
    %16 = vector.load %arg4[%c2, %c0_11, %c0_12] : memref<3x128x1xf32, #tpu.memory_space<vmem>>, vector<1x128x1xf32>
    %17 = vector.shape_cast %16 : vector<1x128x1xf32> to vector<128x1xf32>
    %18 = vector.broadcast %17 : vector<128x1xf32> to vector<128x4xf32>
    %19 = arith.mulf %15, %18 : vector<128x4xf32>
    %c2_13 = arith.constant 2 : index
    %c0_14 = arith.constant 0 : index
    %c0_15 = arith.constant 0 : index
    %20 = vector.load %arg2[%c2_13, %c0_14, %c0_15] : memref<3x4x8xf32, #tpu.memory_space<vmem>>, vector<1x4x8xf32>
    %21 = vector.shape_cast %20 : vector<1x4x8xf32> to vector<4x8xf32>
    %cst_16 = arith.constant dense<0.000000e+00> : vector<128x8xf32>
    %22 = tpu.matmul %19, %21, %cst_16 {dimension_numbers = #tpu.dot_dimension_numbers<[1], [0], [0], [1], [0, 0, 1, 1], [], []>} : vector<128x4xf32>, vector<4x8xf32>, vector<128x8xf32> -> vector<128x8xf32>
    %23 = arith.addf %14, %22 : vector<128x8xf32>
    %c0_17 = arith.constant 0 : index
    %c0_18 = arith.constant 0 : index
    %24 = vector.load %arg3[%c0_17, %c0_18] : memref<1x8xf32, #tpu.memory_space<vmem>>, vector<1x8xf32>
    %25 = vector.broadcast %24 : vector<1x8xf32> to vector<128x8xf32>
    %26 = arith.addf %23, %25 : vector<128x8xf32>
    %cst_19 = arith.constant 0.000000e+00 : f32
    %27 = vector.broadcast %cst_19 : f32 to vector<128x8xf32>
    %28 = arith.maximumf %26, %27 : vector<128x8xf32>
    %cst_20 = arith.constant 0.000000e+00 : f32
    %29 = vector.broadcast %cst_20 : f32 to vector<128x16xf32>
    %c1_i32_21 = arith.constant 1 : i32
    %30 = tpu.dynamic_rotate %28 by %c1_i32_21 dim 0 : vector<128x8xf32>, i32 -> vector<128x8xf32>
    %c0_22 = arith.constant 0 : index
    %c0_23 = arith.constant 0 : index
    %c0_24 = arith.constant 0 : index
    %31 = vector.load %arg7[%c0_22, %c0_23, %c0_24] : memref<3x128x1xf32, #tpu.memory_space<vmem>>, vector<1x128x1xf32>
    %32 = vector.shape_cast %31 : vector<1x128x1xf32> to vector<128x1xf32>
    %33 = vector.broadcast %32 : vector<128x1xf32> to vector<128x8xf32>
    %34 = arith.mulf %30, %33 : vector<128x8xf32>
    %c0_25 = arith.constant 0 : index
    %c0_26 = arith.constant 0 : index
    %c0_27 = arith.constant 0 : index
    %35 = vector.load %arg5[%c0_25, %c0_26, %c0_27] : memref<3x8x16xf32, #tpu.memory_space<vmem>>, vector<1x8x16xf32>
    %36 = vector.shape_cast %35 : vector<1x8x16xf32> to vector<8x16xf32>
    %cst_28 = arith.constant dense<0.000000e+00> : vector<128x16xf32>
    %37 = tpu.matmul %34, %36, %cst_28 {dimension_numbers = #tpu.dot_dimension_numbers<[1], [0], [0], [1], [0, 0, 1, 1], [], []>} : vector<128x8xf32>, vector<8x16xf32>, vector<128x16xf32> -> vector<128x16xf32>
    %38 = arith.addf %29, %37 : vector<128x16xf32>
    %c1_29 = arith.constant 1 : index
    %c0_30 = arith.constant 0 : index
    %c0_31 = arith.constant 0 : index
    %39 = vector.load %arg5[%c1_29, %c0_30, %c0_31] : memref<3x8x16xf32, #tpu.memory_space<vmem>>, vector<1x8x16xf32>
    %40 = vector.shape_cast %39 : vector<1x8x16xf32> to vector<8x16xf32>
    %cst_32 = arith.constant dense<0.000000e+00> : vector<128x16xf32>
    %41 = tpu.matmul %28, %40, %cst_32 {dimension_numbers = #tpu.dot_dimension_numbers<[1], [0], [0], [1], [0, 0, 1, 1], [], []>} : vector<128x8xf32>, vector<8x16xf32>, vector<128x16xf32> -> vector<128x16xf32>
    %42 = arith.addf %38, %41 : vector<128x16xf32>
    %c127_i32_33 = arith.constant 127 : i32
    %43 = tpu.dynamic_rotate %28 by %c127_i32_33 dim 0 : vector<128x8xf32>, i32 -> vector<128x8xf32>
    %c2_34 = arith.constant 2 : index
    %c0_35 = arith.constant 0 : index
    %c0_36 = arith.constant 0 : index
    %44 = vector.load %arg7[%c2_34, %c0_35, %c0_36] : memref<3x128x1xf32, #tpu.memory_space<vmem>>, vector<1x128x1xf32>
    %45 = vector.shape_cast %44 : vector<1x128x1xf32> to vector<128x1xf32>
    %46 = vector.broadcast %45 : vector<128x1xf32> to vector<128x8xf32>
    %47 = arith.mulf %43, %46 : vector<128x8xf32>
    %c2_37 = arith.constant 2 : index
    %c0_38 = arith.constant 0 : index
    %c0_39 = arith.constant 0 : index
    %48 = vector.load %arg5[%c2_37, %c0_38, %c0_39] : memref<3x8x16xf32, #tpu.memory_space<vmem>>, vector<1x8x16xf32>
    %49 = vector.shape_cast %48 : vector<1x8x16xf32> to vector<8x16xf32>
    %cst_40 = arith.constant dense<0.000000e+00> : vector<128x16xf32>
    %50 = tpu.matmul %47, %49, %cst_40 {dimension_numbers = #tpu.dot_dimension_numbers<[1], [0], [0], [1], [0, 0, 1, 1], [], []>} : vector<128x8xf32>, vector<8x16xf32>, vector<128x16xf32> -> vector<128x16xf32>
    %51 = arith.addf %42, %50 : vector<128x16xf32>
    %c0_41 = arith.constant 0 : index
    %c0_42 = arith.constant 0 : index
    %52 = vector.load %arg8[%c0_41, %c0_42] : memref<64x128xf32, #tpu.memory_space<vmem>>, vector<64x128xf32>
    %cst_43 = arith.constant dense<0.000000e+00> : vector<64x16xf32>
    %53 = tpu.matmul %52, %51, %cst_43 {dimension_numbers = #tpu.dot_dimension_numbers<[1], [0], [0], [1], [0, 0, 1, 1], [], []>} : vector<64x128xf32>, vector<128x16xf32>, vector<64x16xf32> -> vector<64x16xf32>
    %c0_44 = arith.constant 0 : index
    %c0_45 = arith.constant 0 : index
    %54 = vector.load %arg6[%c0_44, %c0_45] : memref<1x16xf32, #tpu.memory_space<vmem>>, vector<1x16xf32>
    %55 = vector.broadcast %54 : vector<1x16xf32> to vector<64x16xf32>
    %56 = arith.addf %53, %55 : vector<64x16xf32>
    %cst_46 = arith.constant 0.000000e+00 : f32
    %57 = vector.broadcast %cst_46 : f32 to vector<64x16xf32>
    %58 = arith.maximumf %56, %57 : vector<64x16xf32>
    %cst_47 = arith.constant 0.000000e+00 : f32
    %59 = vector.broadcast %cst_47 : f32 to vector<8x128xf32>
    %c0_48 = arith.constant 0 : index
    %c0_49 = arith.constant 0 : index
    %c0_50 = arith.constant 0 : index
    %60 = vector.load %arg9[%c0_48, %c0_49, %c0_50] : memref<8x8x64xf32, #tpu.memory_space<vmem>>, vector<1x8x64xf32>
    %61 = vector.shape_cast %60 : vector<1x8x64xf32> to vector<8x64xf32>
    %cst_51 = arith.constant dense<0.000000e+00> : vector<8x16xf32>
    %62 = tpu.matmul %61, %58, %cst_51 {dimension_numbers = #tpu.dot_dimension_numbers<[1], [0], [0], [1], [0, 0, 1, 1], [], []>} : vector<8x64xf32>, vector<64x16xf32>, vector<8x16xf32> -> vector<8x16xf32>
    %c0_52 = arith.constant 0 : index
    %c0_53 = arith.constant 0 : index
    %c0_54 = arith.constant 0 : index
    %63 = vector.load %arg10[%c0_52, %c0_53, %c0_54] : memref<8x16x128xf32, #tpu.memory_space<vmem>>, vector<1x16x128xf32>
    %64 = vector.shape_cast %63 : vector<1x16x128xf32> to vector<16x128xf32>
    %cst_55 = arith.constant dense<0.000000e+00> : vector<8x128xf32>
    %65 = tpu.matmul %62, %64, %cst_55 {dimension_numbers = #tpu.dot_dimension_numbers<[1], [0], [0], [1], [0, 0, 1, 1], [], []>} : vector<8x16xf32>, vector<16x128xf32>, vector<8x128xf32> -> vector<8x128xf32>
    %66 = arith.addf %59, %65 : vector<8x128xf32>
    %c1_56 = arith.constant 1 : index
    %c0_57 = arith.constant 0 : index
    %c0_58 = arith.constant 0 : index
    %67 = vector.load %arg9[%c1_56, %c0_57, %c0_58] : memref<8x8x64xf32, #tpu.memory_space<vmem>>, vector<1x8x64xf32>
    %68 = vector.shape_cast %67 : vector<1x8x64xf32> to vector<8x64xf32>
    %cst_59 = arith.constant dense<0.000000e+00> : vector<8x16xf32>
    %69 = tpu.matmul %68, %58, %cst_59 {dimension_numbers = #tpu.dot_dimension_numbers<[1], [0], [0], [1], [0, 0, 1, 1], [], []>} : vector<8x64xf32>, vector<64x16xf32>, vector<8x16xf32> -> vector<8x16xf32>
    %c1_60 = arith.constant 1 : index
    %c0_61 = arith.constant 0 : index
    %c0_62 = arith.constant 0 : index
    %70 = vector.load %arg10[%c1_60, %c0_61, %c0_62] : memref<8x16x128xf32, #tpu.memory_space<vmem>>, vector<1x16x128xf32>
    %71 = vector.shape_cast %70 : vector<1x16x128xf32> to vector<16x128xf32>
    %cst_63 = arith.constant dense<0.000000e+00> : vector<8x128xf32>
    %72 = tpu.matmul %69, %71, %cst_63 {dimension_numbers = #tpu.dot_dimension_numbers<[1], [0], [0], [1], [0, 0, 1, 1], [], []>} : vector<8x16xf32>, vector<16x128xf32>, vector<8x128xf32> -> vector<8x128xf32>
    %73 = arith.addf %66, %72 : vector<8x128xf32>
    %c2_64 = arith.constant 2 : index
    %c0_65 = arith.constant 0 : index
    %c0_66 = arith.constant 0 : index
    %74 = vector.load %arg9[%c2_64, %c0_65, %c0_66] : memref<8x8x64xf32, #tpu.memory_space<vmem>>, vector<1x8x64xf32>
    %75 = vector.shape_cast %74 : vector<1x8x64xf32> to vector<8x64xf32>
    %cst_67 = arith.constant dense<0.000000e+00> : vector<8x16xf32>
    %76 = tpu.matmul %75, %58, %cst_67 {dimension_numbers = #tpu.dot_dimension_numbers<[1], [0], [0], [1], [0, 0, 1, 1], [], []>} : vector<8x64xf32>, vector<64x16xf32>, vector<8x16xf32> -> vector<8x16xf32>
    %c2_68 = arith.constant 2 : index
    %c0_69 = arith.constant 0 : index
    %c0_70 = arith.constant 0 : index
    %77 = vector.load %arg10[%c2_68, %c0_69, %c0_70] : memref<8x16x128xf32, #tpu.memory_space<vmem>>, vector<1x16x128xf32>
    %78 = vector.shape_cast %77 : vector<1x16x128xf32> to vector<16x128xf32>
    %cst_71 = arith.constant dense<0.000000e+00> : vector<8x128xf32>
    %79 = tpu.matmul %76, %78, %cst_71 {dimension_numbers = #tpu.dot_dimension_numbers<[1], [0], [0], [1], [0, 0, 1, 1], [], []>} : vector<8x16xf32>, vector<16x128xf32>, vector<8x128xf32> -> vector<8x128xf32>
    %80 = arith.addf %73, %79 : vector<8x128xf32>
    %c3 = arith.constant 3 : index
    %c0_72 = arith.constant 0 : index
    %c0_73 = arith.constant 0 : index
    %81 = vector.load %arg9[%c3, %c0_72, %c0_73] : memref<8x8x64xf32, #tpu.memory_space<vmem>>, vector<1x8x64xf32>
    %82 = vector.shape_cast %81 : vector<1x8x64xf32> to vector<8x64xf32>
    %cst_74 = arith.constant dense<0.000000e+00> : vector<8x16xf32>
    %83 = tpu.matmul %82, %58, %cst_74 {dimension_numbers = #tpu.dot_dimension_numbers<[1], [0], [0], [1], [0, 0, 1, 1], [], []>} : vector<8x64xf32>, vector<64x16xf32>, vector<8x16xf32> -> vector<8x16xf32>
    %c3_75 = arith.constant 3 : index
    %c0_76 = arith.constant 0 : index
    %c0_77 = arith.constant 0 : index
    %84 = vector.load %arg10[%c3_75, %c0_76, %c0_77] : memref<8x16x128xf32, #tpu.memory_space<vmem>>, vector<1x16x128xf32>
    %85 = vector.shape_cast %84 : vector<1x16x128xf32> to vector<16x128xf32>
    %cst_78 = arith.constant dense<0.000000e+00> : vector<8x128xf32>
    %86 = tpu.matmul %83, %85, %cst_78 {dimension_numbers = #tpu.dot_dimension_numbers<[1], [0], [0], [1], [0, 0, 1, 1], [], []>} : vector<8x16xf32>, vector<16x128xf32>, vector<8x128xf32> -> vector<8x128xf32>
    %87 = arith.addf %80, %86 : vector<8x128xf32>
    %c4 = arith.constant 4 : index
    %c0_79 = arith.constant 0 : index
    %c0_80 = arith.constant 0 : index
    %88 = vector.load %arg9[%c4, %c0_79, %c0_80] : memref<8x8x64xf32, #tpu.memory_space<vmem>>, vector<1x8x64xf32>
    %89 = vector.shape_cast %88 : vector<1x8x64xf32> to vector<8x64xf32>
    %cst_81 = arith.constant dense<0.000000e+00> : vector<8x16xf32>
    %90 = tpu.matmul %89, %58, %cst_81 {dimension_numbers = #tpu.dot_dimension_numbers<[1], [0], [0], [1], [0, 0, 1, 1], [], []>} : vector<8x64xf32>, vector<64x16xf32>, vector<8x16xf32> -> vector<8x16xf32>
    %c4_82 = arith.constant 4 : index
    %c0_83 = arith.constant 0 : index
    %c0_84 = arith.constant 0 : index
    %91 = vector.load %arg10[%c4_82, %c0_83, %c0_84] : memref<8x16x128xf32, #tpu.memory_space<vmem>>, vector<1x16x128xf32>
    %92 = vector.shape_cast %91 : vector<1x16x128xf32> to vector<16x128xf32>
    %cst_85 = arith.constant dense<0.000000e+00> : vector<8x128xf32>
    %93 = tpu.matmul %90, %92, %cst_85 {dimension_numbers = #tpu.dot_dimension_numbers<[1], [0], [0], [1], [0, 0, 1, 1], [], []>} : vector<8x16xf32>, vector<16x128xf32>, vector<8x128xf32> -> vector<8x128xf32>
    %94 = arith.addf %87, %93 : vector<8x128xf32>
    %c5 = arith.constant 5 : index
    %c0_86 = arith.constant 0 : index
    %c0_87 = arith.constant 0 : index
    %95 = vector.load %arg9[%c5, %c0_86, %c0_87] : memref<8x8x64xf32, #tpu.memory_space<vmem>>, vector<1x8x64xf32>
    %96 = vector.shape_cast %95 : vector<1x8x64xf32> to vector<8x64xf32>
    %cst_88 = arith.constant dense<0.000000e+00> : vector<8x16xf32>
    %97 = tpu.matmul %96, %58, %cst_88 {dimension_numbers = #tpu.dot_dimension_numbers<[1], [0], [0], [1], [0, 0, 1, 1], [], []>} : vector<8x64xf32>, vector<64x16xf32>, vector<8x16xf32> -> vector<8x16xf32>
    %c5_89 = arith.constant 5 : index
    %c0_90 = arith.constant 0 : index
    %c0_91 = arith.constant 0 : index
    %98 = vector.load %arg10[%c5_89, %c0_90, %c0_91] : memref<8x16x128xf32, #tpu.memory_space<vmem>>, vector<1x16x128xf32>
    %99 = vector.shape_cast %98 : vector<1x16x128xf32> to vector<16x128xf32>
    %cst_92 = arith.constant dense<0.000000e+00> : vector<8x128xf32>
    %100 = tpu.matmul %97, %99, %cst_92 {dimension_numbers = #tpu.dot_dimension_numbers<[1], [0], [0], [1], [0, 0, 1, 1], [], []>} : vector<8x16xf32>, vector<16x128xf32>, vector<8x128xf32> -> vector<8x128xf32>
    %101 = arith.addf %94, %100 : vector<8x128xf32>
    %c6 = arith.constant 6 : index
    %c0_93 = arith.constant 0 : index
    %c0_94 = arith.constant 0 : index
    %102 = vector.load %arg9[%c6, %c0_93, %c0_94] : memref<8x8x64xf32, #tpu.memory_space<vmem>>, vector<1x8x64xf32>
    %103 = vector.shape_cast %102 : vector<1x8x64xf32> to vector<8x64xf32>
    %cst_95 = arith.constant dense<0.000000e+00> : vector<8x16xf32>
    %104 = tpu.matmul %103, %58, %cst_95 {dimension_numbers = #tpu.dot_dimension_numbers<[1], [0], [0], [1], [0, 0, 1, 1], [], []>} : vector<8x64xf32>, vector<64x16xf32>, vector<8x16xf32> -> vector<8x16xf32>
    %c6_96 = arith.constant 6 : index
    %c0_97 = arith.constant 0 : index
    %c0_98 = arith.constant 0 : index
    %105 = vector.load %arg10[%c6_96, %c0_97, %c0_98] : memref<8x16x128xf32, #tpu.memory_space<vmem>>, vector<1x16x128xf32>
    %106 = vector.shape_cast %105 : vector<1x16x128xf32> to vector<16x128xf32>
    %cst_99 = arith.constant dense<0.000000e+00> : vector<8x128xf32>
    %107 = tpu.matmul %104, %106, %cst_99 {dimension_numbers = #tpu.dot_dimension_numbers<[1], [0], [0], [1], [0, 0, 1, 1], [], []>} : vector<8x16xf32>, vector<16x128xf32>, vector<8x128xf32> -> vector<8x128xf32>
    %108 = arith.addf %101, %107 : vector<8x128xf32>
    %c7 = arith.constant 7 : index
    %c0_100 = arith.constant 0 : index
    %c0_101 = arith.constant 0 : index
    %109 = vector.load %arg9[%c7, %c0_100, %c0_101] : memref<8x8x64xf32, #tpu.memory_space<vmem>>, vector<1x8x64xf32>
    %110 = vector.shape_cast %109 : vector<1x8x64xf32> to vector<8x64xf32>
    %cst_102 = arith.constant dense<0.000000e+00> : vector<8x16xf32>
    %111 = tpu.matmul %110, %58, %cst_102 {dimension_numbers = #tpu.dot_dimension_numbers<[1], [0], [0], [1], [0, 0, 1, 1], [], []>} : vector<8x64xf32>, vector<64x16xf32>, vector<8x16xf32> -> vector<8x16xf32>
    %c7_103 = arith.constant 7 : index
    %c0_104 = arith.constant 0 : index
    %c0_105 = arith.constant 0 : index
    %112 = vector.load %arg10[%c7_103, %c0_104, %c0_105] : memref<8x16x128xf32, #tpu.memory_space<vmem>>, vector<1x16x128xf32>
    %113 = vector.shape_cast %112 : vector<1x16x128xf32> to vector<16x128xf32>
    %cst_106 = arith.constant dense<0.000000e+00> : vector<8x128xf32>
    %114 = tpu.matmul %111, %113, %cst_106 {dimension_numbers = #tpu.dot_dimension_numbers<[1], [0], [0], [1], [0, 0, 1, 1], [], []>} : vector<8x16xf32>, vector<16x128xf32>, vector<8x128xf32> -> vector<8x128xf32>
    %115 = arith.addf %108, %114 : vector<8x128xf32>
    %c0_107 = arith.constant 0 : index
    %c0_108 = arith.constant 0 : index
    %116 = vector.load %arg11[%c0_107, %c0_108] : memref<8x128xf32, #tpu.memory_space<vmem>>, vector<8x128xf32>
    tpu.vector_store %arg11[%c0_107, %c0_108], %115 {strides = array<i32>} : memref<8x128xf32, #tpu.memory_space<vmem>>, vector<8x128xf32>,
    return
  }
  func.func @transform_0(%arg0: i32) -> (i32, i32) {
    %c0_i32 = arith.constant 0 : i32
    %c0_i32_0 = arith.constant 0 : i32
    return %arg0, %c0_i32 : i32, i32
  }
  func.func @transform_1(%arg0: i32) -> (i32, i32, i32) {
    %c0_i32 = arith.constant 0 : i32
    %c0_i32_0 = arith.constant 0 : i32
    %c0_i32_1 = arith.constant 0 : i32
    %c0_i32_2 = arith.constant 0 : i32
    return %c0_i32, %c0_i32_0, %c0_i32_1 : i32, i32, i32
  }
  func.func @transform_2(%arg0: i32) -> (i32, i32) {
    %c0_i32 = arith.constant 0 : i32
    %c0_i32_0 = arith.constant 0 : i32
    %c0_i32_1 = arith.constant 0 : i32
    return %c0_i32, %c0_i32_0 : i32, i32
  }
  func.func @transform_3(%arg0: i32) -> (i32, i32, i32) {
    %c0_i32 = arith.constant 0 : i32
    %c0_i32_0 = arith.constant 0 : i32
    %c0_i32_1 = arith.constant 0 : i32
    %c0_i32_2 = arith.constant 0 : i32
    return %c0_i32, %c0_i32_0, %c0_i32_1 : i32, i32, i32
  }
  func.func @transform_4(%arg0: i32) -> (i32, i32, i32) {
    %c0_i32 = arith.constant 0 : i32
    %c0_i32_0 = arith.constant 0 : i32
    %c0_i32_1 = arith.constant 0 : i32
    %c0_i32_2 = arith.constant 0 : i32
    return %c0_i32, %c0_i32_0, %c0_i32_1 : i32, i32, i32
  }
  func.func @transform_5(%arg0: i32) -> (i32, i32) {
    %c0_i32 = arith.constant 0 : i32
    %c0_i32_0 = arith.constant 0 : i32
    %c0_i32_1 = arith.constant 0 : i32
    return %c0_i32, %c0_i32_0 : i32, i32
  }
  func.func @transform_6(%arg0: i32) -> (i32, i32, i32) {
    %c0_i32 = arith.constant 0 : i32
    %c0_i32_0 = arith.constant 0 : i32
    %c0_i32_1 = arith.constant 0 : i32
    %c0_i32_2 = arith.constant 0 : i32
    return %c0_i32, %c0_i32_0, %c0_i32_1 : i32, i32, i32
  }
  func.func @transform_7(%arg0: i32) -> (i32, i32) {
    %c0_i32 = arith.constant 0 : i32
    %c0_i32_0 = arith.constant 0 : i32
    %c0_i32_1 = arith.constant 0 : i32
    return %c0_i32, %c0_i32_0 : i32, i32
  }
  func.func @transform_8(%arg0: i32) -> (i32, i32, i32) {
    %c0_i32 = arith.constant 0 : i32
    %c0_i32_0 = arith.constant 0 : i32
    %c0_i32_1 = arith.constant 0 : i32
    %c0_i32_2 = arith.constant 0 : i32
    return %c0_i32, %c0_i32_0, %c0_i32_1 : i32, i32, i32
  }
  func.func @transform_9(%arg0: i32) -> (i32, i32, i32) {
    %c0_i32 = arith.constant 0 : i32
    %c0_i32_0 = arith.constant 0 : i32
    %c0_i32_1 = arith.constant 0 : i32
    %c0_i32_2 = arith.constant 0 : i32
    return %c0_i32, %c0_i32_0, %c0_i32_1 : i32, i32, i32
  }
  func.func @transform_10(%arg0: i32) -> (i32, i32) {
    %c0_i32 = arith.constant 0 : i32
    %c0_i32_0 = arith.constant 0 : i32
    return %arg0, %c0_i32 : i32, i32
  }
}

</mosaic_0001>

<bundles_post_ra>
// kernel: conv1d_encoder_forward.1
= control target key start
LH: loop header
LB: loop body
LE: loop exit
PB: predicated region body
PF: predicated region fallthrough
CT: control target
= control target key end

     0   :  { %15 = vsyncpa [#allocation3], 0  ;;  %s2941_s0 = inlined_call_operand.vmem [shape: f32[128,4], index: 0, kind: input, shape index: {}]   ;;  %s2942_s1 = inlined_call_operand.vmem [shape: f32[3,4,8], index: 1, kind: input, shape index: {}]   ;;  %s2943_s2 = inlined_call_operand.vmem [shape: f32[1,8], index: 2, kind: input, shape index: {}]   ;;  %s2944_s3 = inlined_call_operand.hbm [shape: f32[3,128,1], index: 3, kind: input, shape index: {}, may-alias: {3,6}]   ;;  %s2945_s4 = inlined_call_operand.hbm [shape: f32[3,8,16], index: 4, kind: input, shape index: {}]   ;;  %s2946_s5 = inlined_call_operand.vmem [shape: f32[1,16], index: 5, kind: input, shape index: {}]   ;;  %s2947_s6 = inlined_call_operand.hbm [shape: f32[3,128,1], index: 6, kind: input, shape index: {}, may-alias: {3,6}]   ;;  %s2948_s7 = inlined_call_operand.hbm [shape: f32[64,128], index: 7, kind: input, shape index: {}]   ;;  %s2949_s8 = inlined_call_operand.vmem [shape: f32[8,8,64], index: 8, kind: input, shape index: {}]   ;;  %s2950_s9 = inlined_call_operand.vmem [shape: f32[8,16,128], index: 9, kind: input, shape index: {}]   ;;  %s2951_s10 = inlined_call_operand.vmem [shape: f32[8,128], index: 10, kind: output, shape index: {}]  }
   0x1   :  { %16 = vsyncpa [#allocation5], 0 }
   0x2   :  { %17 = vsyncpa [#allocation8], 0  ;;  %s41_s15 = sshll.u32 %s2945_s4, 4  ;;  %s2199_s16 = smov [#allocation4]   ;;  %s42_s15 = int_to_ptr.hbm [resolvable:$true] %s41_s15 }
   0x3   :  { %s43_s17 = sshll.u32 %s2199_s16, 4  ;;  %s28_s20 = sshll.u32 %s2944_s3, 4  ;;  %s44_s17 = int_to_ptr.vmem [resolvable:$true] %s43_s17  ;;  %s29_s20 = int_to_ptr.hbm [resolvable:$true] %s28_s20 }
   0x4   :  { %s2200_s21 = smov 128   ;;  %s2201_s22 = smov 8  }
   0x5   :  { %49 = dma.hbm_to_vmem [thread:$0]  %s42_s15, 384, %s44_s17, [#allocation5], %s2200_s21, %s2200_s21, %s2201_s22  }
   0x6   :  { %s2202_s23 = smov [#allocation2]   ;;  %s56_s27 = sshll.u32 %s2947_s6, 4  ;;  %s57_s27 = int_to_ptr.hbm [resolvable:$true] %s56_s27 }
   0x7   :  { %s30_s24 = sshll.u32 %s2202_s23, 4  ;;  %s69_s29 = sshll.u32 %s2948_s7, 4  ;;  %s31_s24 = int_to_ptr.vmem [resolvable:$true] %s30_s24  ;;  %s70_s29 = int_to_ptr.hbm [resolvable:$true] %s69_s29 }
   0x8   :  { %36 = dma.hbm_to_vmem [thread:$0]  %s29_s20, 6144, %s31_s24, [#allocation3], %s2200_s21, %s2200_s21, %s2201_s22  }
   0x9   :  { %s2203_s30 = smov [#allocation6]   ;;  %s2204_s3 = smov [#allocation7]  }
   0xa   :  { %s58_s11 = sshll.u32 %s2203_s30, 4  ;;  %s71_s12 = sshll.u32 %s2204_s3, 4  ;;  %s59_s11 = int_to_ptr.vmem [resolvable:$true] %s58_s11  ;;  %s72_s12 = int_to_ptr.vmem [resolvable:$true] %s71_s12 }
   0xb   :  { %64 = dma.hbm_to_vmem [thread:$0]  %s57_s27, 6144, %s59_s11, [#allocation5], %s2200_s21, %s2200_s21, %s2201_s22  }
   0xc   :  { %77 = dma.hbm_to_vmem [thread:$0]  %s70_s29, 1024, %s72_s12, [#allocation8], %s2200_s21, %s2200_s21, %s2201_s22  }
   0xd   :  { %2193 = dma.done.wait [#allocation3], 6144  }
   0xe   :  { %2194 = vsyncadd [#allocation3], 4294961152 }
   0xf   :  { %2195 = dma.done.wait [#allocation5], 6528  }
  0x10   :  { %2196 = vsyncadd [#allocation5], 4294960768 }
  0x11   :  { %2197 = dma.done.wait [#allocation8], 1024  }
  0x12   :  { %2198 = vsyncadd [#allocation8], 4294966272  ;;  %v2205_v0 = vmov 0   ;;  %v534_v1 = vld [vmem:[#allocation2 + $0x110] sm:$0xff]  ;;  %v533_v2 = vld [vmem:[#allocation2 + $0x108] sm:$0xff]  ;;  %vm313_vm0 = vcmask 1043456   ;;  %v130_v47 = vlaneseq }
  0x13   :  { %2094 = vset.pattern.permute.xlu2 %v2205_v0  ;;  %2093 = vset.pattern.permute.xlu1 %v2205_v0  ;;  %v532_v3 = vld [vmem:[#allocation2 + $0x100] sm:$0xff]  ;;  %v151_v4 = vld [vmem:[#allocation2 + $0x10] sm:$0xff]  ;;  %v150_v5 = vld [vmem:[#allocation2 + $0x8] sm:$0xff]  ;;  %vm264_vm1 = vcmask 31744   ;;  %vm961_vm4 = vcmask 64512   ;;  %vm1526_vm5 = vcmask 523264  }
  0x14   :  { %2092 = vset.pattern.permute.xlu0 %v2205_v0  ;;  %560 = vperm.xlu2 %2094, %v534_v1   ;;  %v149_v6 = vld [vmem:[#allocation2] sm:$0xff]  ;;  %v152_v8 = vld [vmem:[#allocation2 + $0x18] sm:$0xff]  ;;  %v154_v10 = vld [vmem:[#allocation2 + $0x28] sm:$0xff]  ;;  %v2299_v49 = vshrl.u32 %v130_v47, 7  ;;  %vm1580_vm6 = vcmask 130048  }
  0x15   :  { %555 = vperm.xlu1 %2093, %v533_v2   ;;  %550 = vperm.xlu0 %2092, %v532_v3   ;;  %v536_v7 = vld [vmem:[#allocation2 + $0x120] sm:$0xff]  ;;  %v535_v9 = vld [vmem:[#allocation2 + $0x118] sm:$0xff]  ;;  %v537_v11 = vld [vmem:[#allocation2 + $0x128] sm:$0xff] }
  0x16   :  { %v153_v12 = vld [vmem:[#allocation2 + $0x20] sm:$0xff]  ;;  %v539_v13 = vld [vmem:[#allocation2 + $0x138] sm:$0xff]  ;;  %v155_v14 = vld [vmem:[#allocation2 + $0x30] sm:$0xff]  ;;  %vm514_vm2 = vcmp.lt.s32.totalorder %v2299_v49, 7  ;;  %vm132_vm3 = vcmp.lt.s32.totalorder %v2299_v49, 1 }
  0x17   :  { %v538_v15 = vld [vmem:[#allocation2 + $0x130] sm:$0xff]  ;;  %v157_v16 = vld [vmem:[#allocation2 + $0x40] sm:$0xff]  ;;  %v156_v18 = vld [vmem:[#allocation2 + $0x38] sm:$0xff] }
  0x18   :  { %v540_v17 = vld [vmem:[#allocation2 + $0x140] sm:$0xff]  ;;  %v542_v19 = vld [vmem:[#allocation2 + $0x150] sm:$0xff]  ;;  %v158_v20 = vld [vmem:[#allocation2 + $0x48] sm:$0xff] }
  0x19   :  { %v541_v21 = vld [vmem:[#allocation2 + $0x148] sm:$0xff]  ;;  %v160_v22 = vld [vmem:[#allocation2 + $0x58] sm:$0xff]  ;;  %v159_v24 = vld [vmem:[#allocation2 + $0x50] sm:$0xff] }
  0x1a   :  { %v543_v23 = vld [vmem:[#allocation2 + $0x158] sm:$0xff]  ;;  %v545_v25 = vld [vmem:[#allocation2 + $0x168] sm:$0xff]  ;;  %v161_v26 = vld [vmem:[#allocation2 + $0x60] sm:$0xff] }
  0x1b   :  { %v544_v27 = vld [vmem:[#allocation2 + $0x160] sm:$0xff]  ;;  %v163_v28 = vld [vmem:[#allocation2 + $0x70] sm:$0xff]  ;;  %v162_v30 = vld [vmem:[#allocation2 + $0x68] sm:$0xff] }
  0x1c   :  { %177 = vperm.xlu2 %2094, %v151_v4   ;;  %v546_v29 = vld [vmem:[#allocation2 + $0x170] sm:$0xff]  ;;  %v846_v31 = vld [vmem:[#allocation6] sm:$0xff]  ;;  %v1982_v34 = vld [vmem:[%s2942_s1 + $0x8] sm:$0xf] }
  0x1d   :  { %172 = vperm.xlu1 %2093, %v150_v5   ;;  %167 = vperm.xlu0 %2092, %v149_v6   ;;  %v164_v32 = vld [vmem:[#allocation2 + $0x78] sm:$0xff]  ;;  %v1222_v35 = vld [vmem:[#allocation6 + $0x108] sm:$0xff]  ;;  %v849_v40 = vld [vmem:[#allocation6 + $0x18] sm:$0xff] }
  0x1e   :  { %v547_v33 = vld [vmem:[#allocation2 + $0x178] sm:$0xff]  ;;  %v847_v36 = vld [vmem:[#allocation6 + $0x8] sm:$0xff]  ;;  %1983 = vmatpush.msk.msra.mxu2 %vm313_vm0, %v1982_v34  ;;  %v1223_v41 = vld [vmem:[#allocation6 + $0x110] sm:$0xff] }
  0x1f   :  { %v1221_v37 = vld [vmem:[#allocation6 + $0x100] sm:$0xff]  ;;  %v1947_v38 = vld [vmem:[%s2942_s1 + $0x4] sm:$0xf]  ;;  %v261_v39 = vld [vmem:[%s2942_s1] sm:$0xf] }
  0x20   :  { %v2286_v42 = vld [vmem:[%s2941_s0] sm:$0xff]  ;;  %1948 = vmatpush.msk.msra.mxu0 %vm313_vm0, %v1947_v38  ;;  %1965 = vmatpush.msk.msra.mxu1 %vm313_vm0, %v261_v39  ;;  %v848_v43 = vld [vmem:[#allocation6 + $0x10] sm:$0xff]  ;;  %v1225_v45 = vld [vmem:[#allocation6 + $0x120] sm:$0xff] }
  0x21   :  { %1949 = vmatmul.msk.f32.vlgmr.msra.gmra.mxu0 %vm264_vm1, %v2286_v42  ;;  %v2295_v44 = vld [vmem:[%s2941_s0 + $0x8] sm:$0xff]  ;;  %v850_v46 = vld [vmem:[#allocation6 + $0x20] sm:$0xff]  ;;  %v1224_v48 = vld [vmem:[#allocation6 + $0x118] sm:$0xff]  ;;  %v498_v54 = vrot.slane %v2286_v42, 1  ;;  %v114_v0 = vrot.slane %v2286_v42, 7 }
  0x22   :  { %v2304_v50 = vld [vmem:[%s2941_s0 + $0x10] sm:$0xff]  ;;  %v852_v51 = vld [vmem:[#allocation6 + $0x30] sm:$0xff]  ;;  %v1226_v52 = vld [vmem:[#allocation6 + $0x128] sm:$0xff]  ;;  %v499_v53 = vrot.slane %v2295_v44, 1 }
  0x23   :  { %v851_v55 = vld [vmem:[#allocation6 + $0x28] sm:$0xff]  ;;  %v2318_v57 = vld [vmem:[%s2941_s0 + $0x78] sm:$0xff]  ;;  %v500_v58 = vrot.slane %v2304_v50, 1  ;;  %v1228_v62 = vld [vmem:[#allocation6 + $0x138] sm:$0xff] }
  0x24   :  { %570 = vperm.xlu2 %2094, %v536_v7   ;;  %v529_v56 = vsel %vm514_vm2, %v498_v54, %v499_v53  ;;  %v2324_v61 = vld [vmem:[%s2941_s0 + $0x18] sm:$0xff]  ;;  %v853_v63 = vld [vmem:[#allocation6 + $0x38] sm:$0xff]  ;;  %v129_v1 = vrot.slane %v2318_v57, 7  ;;  %v1227_v2 = vld [vmem:[#allocation6 + $0x130] sm:$0xff] }
  0x25   :  { %182 = vperm.xlu1 %2093, %v152_v8   ;;  %565 = vperm.xlu0 %2092, %v535_v9   ;;  %v528_v4 = vsel %vm514_vm2, %v499_v53, %v500_v58  ;;  %v501_v7 = vrot.slane %v2324_v61, 1  ;;  %v117_v34 = vrot.slane %v2324_v61, 7  ;;  %v857_v38 = vld [vmem:[#allocation6 + $0x58] sm:$0xff]  ;;  %v1234_v47 = vld [vmem:[#allocation6 + $0x168] sm:$0xff] }
  0x26   :  { %v148_v5 = vsel %vm132_vm3, %v129_v1, %v114_v0 }
  0x29   :  { %1950 = vmatmul.msk.f32.gmra.mxu0 %vm264_vm1, %v2295_v44 }
  0x2c   :  { %192 = vperm.xlu2 %2094, %v154_v10   ;;  %v115_v10 = vrot.slane %v2295_v44, 7 }
  0x2d   :  { %575 = vperm.xlu1 %2093, %v537_v11   ;;  %187 = vperm.xlu0 %2092, %v153_v12   ;;  %v855_v11 = vld [vmem:[#allocation6 + $0x48] sm:$0xff]  ;;  %v1229_v12 = vld [vmem:[#allocation6 + $0x140] sm:$0xff] }
  0x31   :  { %1951 = vmatmul.msk.f32.gmra.mxu0 %vm264_vm1, %v2304_v50 }
  0x34   :  { %585 = vperm.xlu2 %2094, %v539_v13   ;;  %v2343_v13 = vld [vmem:[%s2941_s0 + $0x20] sm:$0xff] }
  0x35   :  { %197 = vperm.xlu1 %2093, %v155_v14   ;;  %580 = vperm.xlu0 %2092, %v538_v15   ;;  %v854_v14 = vld [vmem:[#allocation6 + $0x40] sm:$0xff] }
  0x39   :  { %1952 = vmatmul.msk.f32.gmra.mxu0 %vm264_vm1, %v2324_v61 }
  0x3c   :  { %207 = vperm.xlu2 %2094, %v157_v16   ;;  %v527_v16 = vsel %vm514_vm2, %v500_v58, %v501_v7 }
  0x3d   :  { %590 = vperm.xlu1 %2093, %v540_v17   ;;  %202 = vperm.xlu0 %2092, %v156_v18   ;;  %v147_v18 = vsel %vm132_vm3, %v114_v0, %v115_v10  ;;  %v2402_v0 = vld [vmem:[%s2941_s0 + $0x40] sm:$0xff] }
  0x41   :  { %1953 = vmatmul.msk.f32.gmra.mxu0 %vm264_vm1, %v2343_v13 }
  0x44   :  { %600 = vperm.xlu2 %2094, %v542_v19  }
  0x45   :  { %212 = vperm.xlu1 %2093, %v158_v20   ;;  %595 = vperm.xlu0 %2092, %v541_v21   ;;  %v116_v21 = vrot.slane %v2304_v50, 7  ;;  %v2387_v50 = vld [vmem:[%s2941_s0 + $0x38] sm:$0xff] }
  0x4c   :  { %222 = vperm.xlu2 %2094, %v160_v22   ;;  %v502_v22 = vrot.slane %v2343_v13, 1 }
  0x4d   :  { %605 = vperm.xlu1 %2093, %v543_v23   ;;  %217 = vperm.xlu0 %2092, %v159_v24   ;;  %v1231_v23 = vld [vmem:[#allocation6 + $0x150] sm:$0xff] }
  0x4e   :  { %v856_v24 = vld [vmem:[#allocation6 + $0x50] sm:$0xff] }
  0x54   :  { %615 = vperm.xlu2 %2094, %v545_v25   ;;  %v2358_v25 = vld [vmem:[%s2941_s0 + $0x28] sm:$0xff] }
  0x55   :  { %227 = vperm.xlu1 %2093, %v161_v26   ;;  %610 = vperm.xlu0 %2092, %v544_v27   ;;  %v1230_v26 = vld [vmem:[#allocation6 + $0x148] sm:$0xff]  ;;  %v119_v61 = vrot.slane %v2358_v25, 7 }
  0x56   :  { %1954 = vmatmul.msk.f32.gmra.mxu0 %vm264_vm1, %v2358_v25 }
  0x5c   :  { %237 = vperm.xlu2 %2094, %v163_v28   ;;  %v146_v28 = vsel %vm132_vm3, %v115_v10, %v116_v21  ;;  %v506_v10 = vrot.slane %v2402_v0, 1 }
  0x5d   :  { %620 = vperm.xlu1 %2093, %v546_v29   ;;  %232 = vperm.xlu0 %2092, %v162_v30   ;;  %v526_v30 = vsel %vm514_vm2, %v501_v7, %v502_v22 }
  0x64   :  { %864 = vperm.xlu2 %2094, %v846_v31  }
  0x65   :  { %242 = vperm.xlu1 %2093, %v164_v32   ;;  %625 = vperm.xlu0 %2092, %v547_v33   ;;  %v503_v33 = vrot.slane %v2358_v25, 1 }
  0x6c   :  { %1244 = vperm.xlu2 %2094, %v1222_v35   ;;  %v858_v35 = vld [vmem:[#allocation6 + $0x60] sm:$0xff] }
  0x6d   :  { %869 = vperm.xlu1 %2093, %v847_v36   ;;  %1239 = vperm.xlu0 %2092, %v1221_v37   ;;  %v1232_v36 = vld [vmem:[#allocation6 + $0x158] sm:$0xff] }
  0x6e   :  { %v561_v15 = vpop.permute.xlu2 %560  ;;  %v2373_v37 = vld [vmem:[%s2941_s0 + $0x30] sm:$0xff] }
  0x6f   :  { %v630_v19 = vmul.f32 %v561_v15, %v527_v16  ;;  %1955 = vmatmul.msk.f32.gmra.mxu0 %vm264_vm1, %v2373_v37 }
  0x74   :  { %879 = vperm.xlu2 %2094, %v849_v40   ;;  %v525_v40 = vsel %vm514_vm2, %v502_v22, %v503_v33  ;;  %v121_v22 = vrot.slane %v2387_v50, 7 }
  0x75   :  { %1249 = vperm.xlu1 %2093, %v1223_v41   ;;  %874 = vperm.xlu0 %2092, %v848_v43   ;;  %v145_v41 = vsel %vm132_vm3, %v116_v21, %v117_v34  ;;  %v108_v21 = vld [vmem:[%s2941_s0 + $0x50] sm:$0xff] }
  0x76   :  { %v178_v27 = vpop.permute.xlu2 %177 }
  0x77   :  { %v247_v31 = vmul.f32 %v178_v27, %v146_v28  ;;  %1956 = vmatmul.msk.f32.gmra.mxu0 %vm264_vm1, %v2387_v50 }
  0x7c   :  { %1259 = vperm.xlu2 %2094, %v1225_v45  }
  0x7d   :  { %884 = vperm.xlu1 %2093, %v850_v46   ;;  %1254 = vperm.xlu0 %2092, %v1224_v48   ;;  %v504_v46 = vrot.slane %v2373_v37, 1  ;;  %v859_v48 = vld [vmem:[#allocation6 + $0x68] sm:$0xff] }
  0x7e   :  { %v571_v43 = vpop.permute.xlu2 %570 }
  0x7f   :  { %v632_v44 = vmul.f32 %v571_v43, %v525_v40  ;;  %1957 = vmatmul.msk.f32.gmra.mxu0 %vm264_vm1, %v2402_v0  ;;  %v110_v40 = vld [vmem:[%s2941_s0 + $0x60] sm:$0xff] }
  0x84   :  { %894 = vperm.xlu2 %2094, %v852_v51   ;;  %v1233_v51 = vld [vmem:[#allocation6 + $0x160] sm:$0xff] }
  0x85   :  { %1264 = vperm.xlu1 %2093, %v1226_v52   ;;  %889 = vperm.xlu0 %2092, %v851_v55   ;;  %v118_v52 = vrot.slane %v2343_v13, 7  ;;  %v1236_v13 = vld [vmem:[#allocation6 + $0x178] sm:$0xff] }
  0x87   :  { %v551_v59 = vpop.permute.xlu0 %550  ;;  %v556_v3 = vpop.permute.xlu1 %555  ;;  %v144_v58 = vsel %vm132_vm3, %v117_v34, %v118_v52 }
  0x88   :  { %v628_v60 = vmul.f32 %v551_v59, %v529_v56  ;;  %v629_v6 = vmul.f32 %v556_v3, %v528_v4  ;;  %v524_v56 = vsel %vm514_vm2, %v503_v33, %v504_v46  ;;  %v505_v3 = vrot.slane %v2387_v50, 1  ;;  %v193_v4 = vpop.permute.xlu2 %192  ;;  %v111_v50 = vld [vmem:[%s2941_s0 + $0x68] sm:$0xff] }
  0x8a   :  { %1984 = vmatmul.msk.f32.vlgmr.msra.gmra.mxu2 %vm264_vm1, %v628_v60  ;;  %v523_v7 = vsel %vm514_vm2, %v504_v46, %v505_v3  ;;  %v522_v15 = vsel %vm514_vm2, %v505_v3, %v506_v10 }
  0x8c   :  { %1274 = vperm.xlu2 %2094, %v1228_v62   ;;  %v861_v62 = vld [vmem:[#allocation6 + $0x78] sm:$0xff] }
  0x8d   :  { %899 = vperm.xlu1 %2093, %v853_v63   ;;  %1269 = vperm.xlu0 %2092, %v1227_v2   ;;  %v1235_v63 = vld [vmem:[#allocation6 + $0x170] sm:$0xff] }
  0x8e   :  { %v860_v2 = vld [vmem:[#allocation6 + $0x70] sm:$0xff] }
  0x8f   :  { %v168_v8 = vpop.permute.xlu0 %167  ;;  %v173_v17 = vpop.permute.xlu1 %172 }
  0x90   :  { %v245_v9 = vmul.f32 %v168_v8, %v148_v5  ;;  %v246_v20 = vmul.f32 %v173_v17, %v147_v18  ;;  %v143_v5 = vsel %vm132_vm3, %v118_v52, %v119_v61  ;;  %v586_v17 = vpop.permute.xlu2 %585 }
  0x91   :  { %v250_v8 = vmul.f32 %v193_v4, %v143_v5  ;;  %v635_v18 = vmul.f32 %v586_v17, %v522_v15  ;;  %v513_v15 = vrot.slane %v2318_v57, 1 }
  0x92   :  { %1966 = vmatmul.msk.f32.vlgmr.msra.gmra.mxu1 %vm264_vm1, %v245_v9  ;;  %1985 = vmatmul.msk.f32.gmra.mxu2 %vm264_vm1, %v629_v6 }
  0x94   :  { %909 = vperm.xlu2 %2094, %v855_v11   ;;  %v120_v11 = vrot.slane %v2373_v37, 7 }
  0x95   :  { %1279 = vperm.xlu1 %2093, %v1229_v12   ;;  %904 = vperm.xlu0 %2092, %v854_v14   ;;  %v107_v12 = vld [vmem:[%s2941_s0 + $0x48] sm:$0xff] }
  0x96   :  { %1958 = vmatmul.msk.f32.gmra.mxu0 %vm264_vm1, %v107_v12  ;;  %v142_v16 = vsel %vm132_vm3, %v119_v61, %v120_v11  ;;  %v112_v61 = vld [vmem:[%s2941_s0 + $0x70] sm:$0xff] }
  0x97   :  { %v566_v29 = vpop.permute.xlu0 %565  ;;  %v183_v39 = vpop.permute.xlu1 %182 }
  0x98   :  { %v631_v32 = vmul.f32 %v566_v29, %v526_v30  ;;  %v248_v45 = vmul.f32 %v183_v39, %v145_v41  ;;  %v122_v29 = vrot.slane %v2402_v0, 7  ;;  %v109_v30 = vld [vmem:[%s2941_s0 + $0x58] sm:$0xff]  ;;  %v123_v39 = vrot.slane %v107_v12, 7 }
  0x9a   :  { %1967 = vmatmul.msk.f32.gmra.mxu1 %vm264_vm1, %v246_v20  ;;  %1986 = vmatmul.msk.f32.gmra.mxu2 %vm264_vm1, %v630_v19  ;;  %v507_v20 = vrot.slane %v107_v12, 1  ;;  %v140_v33 = vsel %vm132_vm3, %v121_v22, %v122_v29 }
  0x9c   :  { %1289 = vperm.xlu2 %2094, %v1231_v23   ;;  %v521_v25 = vsel %vm514_vm2, %v506_v10, %v507_v20 }
  0x9d   :  { %914 = vperm.xlu1 %2093, %v856_v24   ;;  %1284 = vperm.xlu0 %2092, %v1230_v26   ;;  %v141_v26 = vsel %vm132_vm3, %v120_v11, %v121_v22 }
  0x9e   :  { %1959 = vmatmul.msk.f32.gmra.mxu0 %vm264_vm1, %v108_v21  ;;  %v334_v12 = vpop.f32.mrf.mxu0 }
  0x9f   :  { %v188_v53 = vpop.permute.xlu0 %187  ;;  %v576_v55 = vpop.permute.xlu1 %575 }
  0xa0   :  { %v633_v59 = vmul.f32 %v576_v55, %v524_v56  ;;  %v249_v60 = vmul.f32 %v188_v53, %v144_v58 }
  0xa2   :  { %1968 = vmatmul.msk.f32.gmra.mxu1 %vm264_vm1, %v247_v31  ;;  %1987 = vmatmul.msk.f32.gmra.mxu2 %vm264_vm1, %v631_v32  ;;  %v208_v31 = vpop.permute.xlu2 %207  ;;  %v508_v32 = vrot.slane %v108_v21, 1 }
  0xa4   :  { %924 = vperm.xlu2 %2094, %v858_v35   ;;  %v520_v35 = vsel %vm514_vm2, %v507_v20, %v508_v32 }
  0xa5   :  { %1294 = vperm.xlu1 %2093, %v1232_v36   ;;  %919 = vperm.xlu0 %2092, %v857_v38   ;;  %v253_v36 = vmul.f32 %v208_v31, %v140_v33  ;;  %v509_v38 = vrot.slane %v109_v30, 1 }
  0xa6   :  { %1960 = vmatmul.msk.f32.gmra.mxu0 %vm264_vm1, %v109_v30 }
  0xa7   :  { %v581_v6 = vpop.permute.xlu0 %580  ;;  %v198_v14 = vpop.permute.xlu1 %197 }
  0xa8   :  { %v634_v9 = vmul.f32 %v581_v6, %v523_v7  ;;  %v251_v19 = vmul.f32 %v198_v14, %v142_v16  ;;  %v512_v6 = vrot.slane %v112_v61, 1  ;;  %v126_v7 = vrot.slane %v110_v40, 7 }
  0xa9   :  { %v127_v16 = vrot.slane %v111_v50, 7 }
  0xaa   :  { %1969 = vmatmul.msk.f32.gmra.mxu1 %vm264_vm1, %v248_v45  ;;  %1988 = vmatmul.msk.f32.gmra.mxu2 %vm264_vm1, %v632_v44  ;;  %v601_v43 = vpop.permute.xlu2 %600  ;;  %v519_v44 = vsel %vm514_vm2, %v508_v32, %v509_v38  ;;  %v139_v45 = vsel %vm132_vm3, %v122_v29, %v123_v39  ;;  %v530_v29 = vsel %vm514_vm2, %v513_v15, %v498_v54  ;;  %v1334_v32 = vld [vmem:[#allocation4 + $0x10] sm:$0xff] }
  0xab   :  { %v638_v46 = vmul.f32 %v601_v43, %v519_v44  ;;  %v135_v20 = vsel %vm132_vm3, %v126_v7, %v127_v16  ;;  %1398 = vmatpush.msrb.mxu1 %v1334_v32 }
  0xac   :  { %1304 = vperm.xlu2 %2094, %v1234_v47  }
  0xad   :  { %929 = vperm.xlu1 %2093, %v859_v48   ;;  %1299 = vperm.xlu0 %2092, %v1233_v51   ;;  %v510_v48 = vrot.slane %v110_v40, 1  ;;  %v124_v51 = vrot.slane %v108_v21, 7  ;;  %v960_v21 = vld [vmem:[#allocation4 + $0x8] sm:$0xff] }
  0xae   :  { %1961 = vmatmul.msk.f32.gmra.mxu0 %vm264_vm1, %v110_v40  ;;  %1025 = vmatpush.msra.mxu3 %v960_v21 }
  0xaf   :  { %v203_v23 = vpop.permute.xlu0 %202  ;;  %v591_v24 = vpop.permute.xlu1 %590  ;;  %v518_v55 = vsel %vm514_vm2, %v509_v38, %v510_v48  ;;  %v138_v56 = vsel %vm132_vm3, %v123_v39, %v124_v51  ;;  %v2510_v39 = vld [vmem:[%s2943_s2] ss:$0 sm:$0xff] }
  0xb0   :  { %v636_v27 = vmul.f32 %v591_v24, %v521_v25  ;;  %v252_v28 = vmul.f32 %v203_v23, %v141_v26  ;;  %v128_v24 = vrot.slane %v112_v61, 7  ;;  %v337_v25 = vpop.f32.mrf.mxu0 }
  0xb2   :  { %1970 = vmatmul.msk.f32.gmra.mxu1 %vm264_vm1, %v249_v60  ;;  %1989 = vmatmul.msk.f32.gmra.mxu2 %vm264_vm1, %v633_v59  ;;  %v125_v60 = vrot.slane %v109_v30, 7 }
  0xb4   :  { %939 = vperm.xlu2 %2094, %v861_v62   ;;  %v223_v62 = vpop.permute.xlu2 %222  ;;  %v137_v0 = vsel %vm132_vm3, %v124_v51, %v125_v60  ;;  %v136_v11 = vsel %vm132_vm3, %v125_v60, %v126_v7 }
  0xb5   :  { %1309 = vperm.xlu1 %2093, %v1235_v63   ;;  %934 = vperm.xlu0 %2092, %v860_v2   ;;  %v511_v63 = vrot.slane %v111_v50, 1  ;;  %v256_v4 = vmul.f32 %v223_v62, %v137_v0 }
  0xb6   :  { %1962 = vmatmul.msk.f32.gmra.mxu0 %vm264_vm1, %v111_v50 }
  0xb7   :  { %v596_v34 = vpop.permute.xlu0 %595  ;;  %v213_v41 = vpop.permute.xlu1 %212  ;;  %v517_v3 = vsel %vm514_vm2, %v510_v48, %v511_v63  ;;  %v516_v10 = vsel %vm514_vm2, %v511_v63, %v512_v6 }
  0xb8   :  { %v637_v37 = vmul.f32 %v596_v34, %v520_v35  ;;  %v254_v47 = vmul.f32 %v213_v41, %v139_v45  ;;  %v340_v33 = vpop.f32.mrf.mxu0  ;;  %v133_v35 = vsel %vm132_vm3, %v128_v24, %v129_v1 }
  0xba   :  { %1971 = vmatmul.msk.f32.gmra.mxu1 %vm264_vm1, %v250_v8  ;;  %1990 = vmatmul.msk.f32.gmra.mxu2 %vm264_vm1, %v634_v9 }
  0xbc   :  { %v616_v9 = vpop.permute.xlu2 %615 }
  0xbd   :  { %1314 = vperm.xlu0 %2092, %v1236_v13   ;;  %v641_v13 = vmul.f32 %v616_v9, %v516_v10 }
  0xbe   :  { %1963 = vmatmul.msk.f32.gmra.mxu0 %vm264_vm1, %v112_v61 }
  0xbf   :  { %v218_v52 = vpop.permute.xlu0 %217  ;;  %v606_v53 = vpop.permute.xlu1 %605 }
  0xc0   :  { %v639_v58 = vmul.f32 %v606_v53, %v518_v55  ;;  %v255_v59 = vmul.f32 %v218_v52, %v138_v56  ;;  %v343_v54 = vpop.f32.mrf.mxu0 }
  0xc2   :  { %1972 = vmatmul.msk.f32.gmra.mxu1 %vm264_vm1, %v251_v19  ;;  %1991 = vmatmul.msk.f32.gmra.mxu2 %vm264_vm1, %v635_v18  ;;  %v515_v19 = vsel %vm514_vm2, %v512_v6, %v513_v15 }
  0xc4   :  { %v238_v26 = vpop.permute.xlu2 %237 }
  0xc6   :  { %1964 = vmatmul.msk.f32.gmra.mxu0 %vm264_vm1, %v2318_v57 }
  0xc7   :  { %v611_v2 = vpop.permute.xlu0 %610  ;;  %v228_v8 = vpop.permute.xlu1 %227 }
  0xc8   :  { %v640_v5 = vmul.f32 %v611_v2, %v517_v3  ;;  %v257_v14 = vmul.f32 %v228_v8, %v136_v11  ;;  %v346_v44 = vpop.f32.mrf.mxu0 }
  0xca   :  { %1973 = vmatmul.msk.f32.gmra.mxu1 %vm264_vm1, %v252_v28  ;;  %1992 = vmatmul.msk.f32.gmra.mxu2 %vm264_vm1, %v636_v27  ;;  %v134_v27 = vsel %vm132_vm3, %v127_v16, %v128_v24 }
  0xcb   :  { %v259_v30 = vmul.f32 %v238_v26, %v134_v27 }
  0xcc   :  { %v2519_v53 = vpop.permute.xlu2 %864 }
  0xcf   :  { %v233_v17 = vpop.permute.xlu0 %232  ;;  %v621_v18 = vpop.permute.xlu1 %620 }
  0xd0   :  { %v642_v22 = vmul.f32 %v621_v18, %v515_v19  ;;  %v258_v23 = vmul.f32 %v233_v17, %v135_v20 }
  0xd2   :  { %1974 = vmatmul.msk.f32.gmra.mxu1 %vm264_vm1, %v253_v36  ;;  %1993 = vmatmul.msk.f32.gmra.mxu2 %vm264_vm1, %v637_v37 }
  0xd3   :  { %v349_v61 = vpop.f32.mrf.mxu0 }
  0xd7   :  { %v626_v28 = vpop.permute.xlu0 %625  ;;  %v243_v34 = vpop.permute.xlu1 %242 }
  0xd8   :  { %v643_v31 = vmul.f32 %v626_v28, %v530_v29  ;;  %v260_v36 = vmul.f32 %v243_v34, %v133_v35 }
  0xda   :  { %1975 = vmatmul.msk.f32.gmra.mxu1 %vm264_vm1, %v254_v47  ;;  %1994 = vmatmul.msk.f32.gmra.mxu2 %vm264_vm1, %v638_v46 }
  0xdf   :  { %v1240_v55 = vpop.permute.xlu0 %1239  ;;  %v870_v62 = vpop.permute.xlu1 %869 }
  0xe2   :  { %1976 = vmatmul.msk.f32.gmra.mxu1 %vm264_vm1, %v255_v59  ;;  %1995 = vmatmul.msk.f32.gmra.mxu2 %vm264_vm1, %v639_v58 }
  0xe7   :  { %v1250_v27 = vpop.permute.xlu1 %1249 }
  0xea   :  { %1977 = vmatmul.msk.f32.gmra.mxu1 %vm264_vm1, %v256_v4  ;;  %1996 = vmatmul.msk.f32.gmra.mxu2 %vm264_vm1, %v640_v5 }
  0xec   :  { %v352_v18 = vpop.f32.mrf.mxu0 }
  0xf2   :  { %1978 = vmatmul.msk.f32.gmra.mxu1 %vm264_vm1, %v257_v14  ;;  %1997 = vmatmul.msk.f32.gmra.mxu2 %vm264_vm1, %v641_v13  ;;  %v875_v13 = vpop.permute.xlu0 %874 }
  0xf4   :  { %v355_v34 = vpop.f32.mrf.mxu0 }
  0xfa   :  { %1979 = vmatmul.msk.f32.gmra.mxu1 %vm264_vm1, %v258_v23  ;;  %1998 = vmatmul.msk.f32.gmra.mxu2 %vm264_vm1, %v642_v22 }
 0x102   :  { %1980 = vmatmul.msk.f32.gmra.mxu1 %vm264_vm1, %v259_v30  ;;  %1999 = vmatmul.msk.f32.gmra.mxu2 %vm264_vm1, %v643_v31 }
 0x10a   :  { %1981 = vmatmul.msk.f32.gmra.mxu1 %vm264_vm1, %v260_v36 }
 0x10d   :  { %v714_v42 = vpop.f32.mrf.mxu2 }
 0x10f   :  { %v450_v37 = vpop.f32.mrf.mxu1 }
 0x110   :  { %v451_v38 = vadd.f32 %v450_v37, %v334_v12  ;;  %v1245_v12 = vpop.permute.xlu2 %1244 }
 0x112   :  { %v762_v40 = vadd.f32 %v714_v42, %v451_v38 }
 0x114   :  { %v782_v41 = vadd.f32 %v2510_v39, %v762_v40  ;;  %v1255_v40 = vpop.permute.xlu0 %1254 }
 0x115   :  { %v717_v43 = vpop.f32.mrf.mxu2 }
 0x116   :  { %v2513_v57 = vmax.f32 %v782_v41, 0.0 }
 0x117   :  { %v453_v1 = vpop.f32.mrf.mxu1 }
 0x118   :  { %v454_v45 = vadd.f32 %v453_v1, %v337_v25  ;;  %2000 = vmatmul.msk.f32.vlgmr.msra.gmra.mxu3 %vm961_vm4, %v2513_v57  ;;  %v814_v51 = vrot.slane %v2513_v57, 7  ;;  %v1188_v56 = vrot.slane %v2513_v57, 1  ;;  %v2553_v42 = vpop.permute.xlu2 %879 }
 0x11a   :  { %v763_v46 = vadd.f32 %v717_v43, %v454_v45 }
 0x11c   :  { %v783_v47 = vadd.f32 %v2510_v39, %v763_v46 }
 0x11d   :  { %v720_v48 = vpop.f32.mrf.mxu2 }
 0x11e   :  { %v799_v50 = vmax.f32 %v783_v47, 0.0 }
 0x11f   :  { %v456_v52 = vpop.f32.mrf.mxu1 }
 0x120   :  { %v457_v58 = vadd.f32 %v456_v52, %v340_v33  ;;  %v815_v59 = vrot.slane %v799_v50, 7  ;;  %2001 = vmatmul.msk.f32.gmra.mxu3 %vm961_vm4, %v799_v50  ;;  %v1189_v60 = vrot.slane %v799_v50, 1  ;;  %v358_v50 = vpop.f32.mrf.mxu0  ;;  %v2564_v52 = vpop.permute.xlu1 %884 }
 0x122   :  { %v764_v63 = vadd.f32 %v720_v48, %v457_v58  ;;  %v1218_v0 = vsel %vm514_vm2, %v1188_v56, %v1189_v60  ;;  %v844_v2 = vsel %vm132_vm3, %v814_v51, %v815_v59 }
 0x123   :  { %v1317_v3 = vmul.f32 %v1240_v55, %v1218_v0  ;;  %v2531_v4 = vmul.f32 %v870_v62, %v844_v2 }
 0x124   :  { %v784_v5 = vadd.f32 %v2510_v39, %v764_v63 }
 0x125   :  { %v723_v6 = vpop.f32.mrf.mxu2  ;;  %2032 = vmatmul.msk.f32.vlgmr.msrb.gmra.mxu1 %vm961_vm4, %v1317_v3 }
 0x126   :  { %v800_v7 = vmax.f32 %v784_v5, 0.0 }
 0x127   :  { %v459_v8 = vpop.f32.mrf.mxu1 }
 0x128   :  { %v460_v9 = vadd.f32 %v459_v8, %v343_v54  ;;  %v816_v10 = vrot.slane %v800_v7, 7  ;;  %2002 = vmatmul.msk.f32.gmra.mxu3 %vm961_vm4, %v800_v7  ;;  %v1190_v11 = vrot.slane %v800_v7, 1  ;;  %v2575_v7 = vpop.permute.xlu0 %889 }
 0x12a   :  { %v765_v14 = vadd.f32 %v723_v6, %v460_v9  ;;  %v1217_v15 = vsel %vm514_vm2, %v1189_v60, %v1190_v11  ;;  %v843_v16 = vsel %vm132_vm3, %v815_v59, %v816_v10  ;;  %v1260_v60 = vpop.permute.xlu2 %1259 }
 0x12b   :  { %v1318_v17 = vmul.f32 %v1245_v12, %v1217_v15  ;;  %v2540_v19 = vmul.f32 %v875_v13, %v843_v16  ;;  %v1265_v12 = vpop.permute.xlu1 %1264 }
 0x12c   :  { %v785_v20 = vadd.f32 %v2510_v39, %v765_v14 }
 0x12d   :  { %v726_v21 = vpop.f32.mrf.mxu2  ;;  %2033 = vmatmul.msk.f32.gmra.mxu1 %vm961_vm4, %v1318_v17 }
 0x12e   :  { %v801_v22 = vmax.f32 %v785_v20, 0.0 }
 0x12f   :  { %v462_v23 = vpop.f32.mrf.mxu1 }
 0x130   :  { %v463_v24 = vadd.f32 %v462_v23, %v346_v44  ;;  %v817_v25 = vrot.slane %v801_v22, 7  ;;  %2003 = vmatmul.msk.f32.gmra.mxu3 %vm961_vm4, %v801_v22  ;;  %v1191_v26 = vrot.slane %v801_v22, 1 }
 0x132   :  { %v766_v28 = vadd.f32 %v726_v21, %v463_v24  ;;  %v1216_v29 = vsel %vm514_vm2, %v1190_v11, %v1191_v26  ;;  %v2549_v30 = vsel %vm132_vm3, %v816_v10, %v817_v25  ;;  %v361_v11 = vpop.f32.mrf.mxu0  ;;  %v2586_v22 = vpop.permute.xlu2 %894 }
 0x133   :  { %v1319_v31 = vmul.f32 %v1250_v27, %v1216_v29 }
 0x134   :  { %v786_v32 = vadd.f32 %v2510_v39, %v766_v28 }
 0x135   :  { %v729_v33 = vpop.f32.mrf.mxu2  ;;  %2034 = vmatmul.msk.f32.gmra.mxu1 %vm961_vm4, %v1319_v31 }
 0x136   :  { %v802_v35 = vmax.f32 %v786_v32, 0.0 }
 0x137   :  { %v465_v36 = vpop.f32.mrf.mxu1 }
 0x138   :  { %v466_v54 = vadd.f32 %v465_v36, %v349_v61  ;;  %v818_v37 = vrot.slane %v802_v35, 7  ;;  %2004 = vmatmul.msk.f32.gmra.mxu3 %vm961_vm4, %v802_v35  ;;  %v1192_v38 = vrot.slane %v802_v35, 1 }
 0x13a   :  { %v767_v41 = vadd.f32 %v729_v33, %v466_v54  ;;  %v1215_v43 = vsel %vm514_vm2, %v1191_v26, %v1192_v38  ;;  %v2560_v1 = vsel %vm132_vm3, %v817_v25, %v818_v37  ;;  %v1270_v26 = vpop.permute.xlu0 %1269  ;;  %v364_v32 = vpop.f32.mrf.mxu0 }
 0x13b   :  { %v1320_v44 = vmul.f32 %v1255_v40, %v1215_v43  ;;  %v2597_v54 = vpop.permute.xlu1 %899  ;;  %v946_v57 = vmul.f32 %v2564_v52, %v2560_v1 }
 0x13c   :  { %v787_v45 = vadd.f32 %v2510_v39, %v767_v41  ;;  %v1275_v41 = vpop.permute.xlu2 %1274 }
 0x13d   :  { %v732_v46 = vpop.f32.mrf.mxu2  ;;  %2035 = vmatmul.msk.f32.gmra.mxu1 %vm961_vm4, %v1320_v44 }
 0x13e   :  { %v803_v47 = vmax.f32 %v787_v45, 0.0 }
 0x13f   :  { %v468_v48 = vpop.f32.mrf.mxu1 }
 0x140   :  { %v469_v55 = vadd.f32 %v468_v48, %v352_v18  ;;  %v819_v58 = vrot.slane %v803_v47, 7  ;;  %2005 = vmatmul.msk.f32.gmra.mxu3 %vm961_vm4, %v803_v47  ;;  %v1193_v59 = vrot.slane %v803_v47, 1 }
 0x142   :  { %v768_v61 = vadd.f32 %v732_v46, %v469_v55  ;;  %v1214_v62 = vsel %vm514_vm2, %v1192_v38, %v1193_v59  ;;  %v2571_v63 = vsel %vm132_vm3, %v818_v37, %v819_v58 }
 0x143   :  { %v1321_v0 = vmul.f32 %v1260_v60, %v1214_v62  ;;  %v947_v49 = vmul.f32 %v2575_v7, %v2571_v63 }
 0x144   :  { %v788_v2 = vadd.f32 %v2510_v39, %v768_v61 }
 0x145   :  { %v735_v3 = vpop.f32.mrf.mxu2  ;;  %2036 = vmatmul.msk.f32.gmra.mxu1 %vm961_vm4, %v1321_v0  ;;  %v1280_v0 = vpop.permute.xlu1 %1279 }
 0x146   :  { %v804_v5 = vmax.f32 %v788_v2, 0.0 }
 0x147   :  { %v471_v6 = vpop.f32.mrf.mxu1 }
 0x148   :  { %v472_v8 = vadd.f32 %v471_v6, %v355_v34  ;;  %v820_v9 = vrot.slane %v804_v5, 7  ;;  %2006 = vmatmul.msk.f32.gmra.mxu3 %vm961_vm4, %v804_v5  ;;  %v1194_v10 = vrot.slane %v804_v5, 1 }
 0x14a   :  { %v769_v13 = vadd.f32 %v735_v3, %v472_v8  ;;  %v1213_v14 = vsel %vm514_vm2, %v1193_v59, %v1194_v10  ;;  %v2582_v15 = vsel %vm132_vm3, %v819_v58, %v820_v9  ;;  %v2608_v59 = vpop.permute.xlu0 %904 }
 0x14b   :  { %v1322_v16 = vmul.f32 %v1265_v12, %v1213_v14  ;;  %v2619_v14 = vpop.permute.xlu2 %909 }
 0x14c   :  { %v789_v17 = vadd.f32 %v2510_v39, %v769_v13 }
 0x14d   :  { %v738_v18 = vpop.f32.mrf.mxu2  ;;  %2037 = vmatmul.msk.f32.gmra.mxu1 %vm961_vm4, %v1322_v16 }
 0x14e   :  { %v805_v20 = vmax.f32 %v789_v17, 0.0 }
 0x14f   :  { %v474_v21 = vpop.f32.mrf.mxu1 }
 0x150   :  { %v475_v23 = vadd.f32 %v474_v21, %v358_v50  ;;  %v821_v24 = vrot.slane %v805_v20, 7  ;;  %2007 = vmatmul.msk.f32.gmra.mxu3 %vm961_vm4, %v805_v20  ;;  %v1195_v25 = vrot.slane %v805_v20, 1  ;;  %v367_v50 = vpop.f32.mrf.mxu0 }
 0x152   :  { %v770_v27 = vadd.f32 %v738_v18, %v475_v23  ;;  %v1212_v28 = vsel %vm514_vm2, %v1194_v10, %v1195_v25  ;;  %v2593_v29 = vsel %vm132_vm3, %v820_v9, %v821_v24  ;;  %v958_v10 = vld [vmem:[#allocation4] sm:$0xff]  ;;  %v1285_v20 = vpop.permute.xlu0 %1284 }
 0x153   :  { %v1323_v31 = vmul.f32 %v1270_v26, %v1212_v28  ;;  %1138 = vmatpush.msrb.mxu0 %v958_v10 }
 0x154   :  { %v790_v33 = vadd.f32 %v2510_v39, %v770_v27 }
 0x155   :  { %v741_v34 = vpop.f32.mrf.mxu2  ;;  %2038 = vmatmul.msk.f32.gmra.mxu1 %vm961_vm4, %v1323_v31 }
 0x156   :  { %v806_v35 = vmax.f32 %v790_v33, 0.0 }
 0x157   :  { %v477_v36 = vpop.f32.mrf.mxu1 }
 0x158   :  { %v478_v37 = vadd.f32 %v477_v36, %v361_v11  ;;  %v822_v38 = vrot.slane %v806_v35, 7  ;;  %2008 = vmatmul.msk.f32.gmra.mxu3 %vm961_vm4, %v806_v35  ;;  %v1196_v40 = vrot.slane %v806_v35, 1  ;;  %v370_v13 = vpop.f32.mrf.mxu0 }
 0x15a   :  { %v771_v43 = vadd.f32 %v741_v34, %v478_v37  ;;  %v1211_v44 = vsel %vm514_vm2, %v1195_v25, %v1196_v40  ;;  %v2604_v45 = vsel %vm132_vm3, %v821_v24, %v822_v38  ;;  %v1290_v37 = vpop.permute.xlu2 %1289 }
 0x15b   :  { %v1324_v46 = vmul.f32 %v1275_v41, %v1211_v44 }
 0x15c   :  { %v791_v47 = vadd.f32 %v2510_v39, %v771_v43 }
 0x15d   :  { %v744_v48 = vpop.f32.mrf.mxu2  ;;  %2039 = vmatmul.msk.f32.gmra.mxu1 %vm961_vm4, %v1324_v46 }
 0x15e   :  { %v807_v55 = vmax.f32 %v791_v47, 0.0 }
 0x15f   :  { %v480_v58 = vpop.f32.mrf.mxu1 }
 0x160   :  { %v481_v60 = vadd.f32 %v480_v58, %v364_v32  ;;  %v823_v61 = vrot.slane %v807_v55, 7  ;;  %2009 = vmatmul.msk.f32.gmra.mxu3 %vm961_vm4, %v807_v55  ;;  %v1197_v62 = vrot.slane %v807_v55, 1  ;;  %v2630_v32 = vpop.permute.xlu1 %914  ;;  %v373_v36 = vpop.f32.mrf.mxu0 }
 0x162   :  { %v772_v2 = vadd.f32 %v744_v48, %v481_v60  ;;  %v1210_v3 = vsel %vm514_vm2, %v1196_v40, %v1197_v62  ;;  %v2615_v5 = vsel %vm132_vm3, %v822_v38, %v823_v61 }
 0x163   :  { %v1325_v6 = vmul.f32 %v1280_v0, %v1210_v3 }
 0x164   :  { %v792_v8 = vadd.f32 %v2510_v39, %v772_v2 }
 0x165   :  { %v747_v9 = vpop.f32.mrf.mxu2  ;;  %2040 = vmatmul.msk.f32.gmra.mxu1 %vm961_vm4, %v1325_v6 }
 0x166   :  { %v808_v11 = vmax.f32 %v792_v8, 0.0 }
 0x167   :  { %v483_v12 = vpop.f32.mrf.mxu1 }
 0x168   :  { %v484_v16 = vadd.f32 %v483_v12, %v367_v50  ;;  %v824_v17 = vrot.slane %v808_v11, 7  ;;  %2010 = vmatmul.msk.f32.gmra.mxu3 %vm961_vm4, %v808_v11  ;;  %v1198_v18 = vrot.slane %v808_v11, 1  ;;  %v2641_v50 = vpop.permute.xlu0 %919  ;;  %v376_v6 = vpop.f32.mrf.mxu0 }
 0x169   :  { %v2652_v12 = vpop.permute.xlu2 %924 }
 0x16a   :  { %v773_v21 = vadd.f32 %v747_v9, %v484_v16  ;;  %v1209_v23 = vsel %vm514_vm2, %v1197_v62, %v1198_v18  ;;  %v2626_v24 = vsel %vm132_vm3, %v823_v61, %v824_v17  ;;  %v1295_v61 = vpop.permute.xlu1 %1294 }
 0x16b   :  { %v1326_v25 = vmul.f32 %v1285_v20, %v1209_v23 }
 0x16c   :  { %v793_v26 = vadd.f32 %v2510_v39, %v773_v21 }
 0x16d   :  { %v750_v27 = vpop.f32.mrf.mxu2  ;;  %2041 = vmatmul.msk.f32.gmra.mxu1 %vm961_vm4, %v1326_v25 }
 0x16e   :  { %v809_v28 = vmax.f32 %v793_v26, 0.0 }
 0x16f   :  { %v486_v31 = vpop.f32.mrf.mxu1 }
 0x170   :  { %v487_v33 = vadd.f32 %v486_v31, %v370_v13  ;;  %v825_v34 = vrot.slane %v809_v28, 7  ;;  %2011 = vmatmul.msk.f32.gmra.mxu3 %vm961_vm4, %v809_v28  ;;  %v1199_v35 = vrot.slane %v809_v28, 1 }
 0x172   :  { %v774_v38 = vadd.f32 %v750_v27, %v487_v33  ;;  %v1208_v40 = vsel %vm514_vm2, %v1198_v18, %v1199_v35  ;;  %v2637_v41 = vsel %vm132_vm3, %v824_v17, %v825_v34  ;;  %v1300_v18 = vpop.permute.xlu0 %1299  ;;  %v379_v27 = vpop.f32.mrf.mxu0 }
 0x173   :  { %v1327_v43 = vmul.f32 %v1290_v37, %v1208_v40  ;;  %v930_v33 = vpop.permute.xlu1 %929  ;;  %v953_v1 = vmul.f32 %v2641_v50, %v2637_v41 }
 0x174   :  { %v794_v44 = vadd.f32 %v2510_v39, %v774_v38  ;;  %v1305_v38 = vpop.permute.xlu2 %1304 }
 0x175   :  { %v753_v46 = vpop.f32.mrf.mxu2  ;;  %2042 = vmatmul.msk.f32.gmra.mxu1 %vm961_vm4, %v1327_v43 }
 0x176   :  { %v810_v47 = vmax.f32 %v794_v44, 0.0 }
 0x177   :  { %v489_v48 = vpop.f32.mrf.mxu1 }
 0x178   :  { %v490_v55 = vadd.f32 %v489_v48, %v373_v36  ;;  %v826_v58 = vrot.slane %v810_v47, 7  ;;  %2012 = vmatmul.msk.f32.gmra.mxu3 %vm961_vm4, %v810_v47  ;;  %v1200_v60 = vrot.slane %v810_v47, 1 }
 0x17a   :  { %v775_v62 = vadd.f32 %v753_v46, %v490_v55  ;;  %v1207_v0 = vsel %vm514_vm2, %v1199_v35, %v1200_v60  ;;  %v2648_v2 = vsel %vm132_vm3, %v825_v34, %v826_v58  ;;  %v935_v55 = vpop.permute.xlu0 %934 }
 0x17b   :  { %v1328_v3 = vmul.f32 %v1295_v61, %v1207_v0  ;;  %v1310_v61 = vpop.permute.xlu1 %1309  ;;  %v954_v52 = vmul.f32 %v2652_v12, %v2648_v2 }
 0x17c   :  { %v795_v8 = vadd.f32 %v2510_v39, %v775_v62 }
 0x17d   :  { %2043 = vmatmul.msk.f32.gmra.mxu1 %vm961_vm4, %v1328_v3  ;;  %v756_v10 = vpop.f32.mrf.mxu2 }
 0x17e   :  { %v811_v9 = vmax.f32 %v795_v8, 0.0 }
 0x17f   :  { %v492_v11 = vpop.f32.mrf.mxu1 }
 0x180   :  { %v493_v13 = vadd.f32 %v492_v11, %v376_v6  ;;  %v827_v16 = vrot.slane %v811_v9, 7  ;;  %2013 = vmatmul.msk.f32.gmra.mxu3 %vm961_vm4, %v811_v9  ;;  %v1201_v17 = vrot.slane %v811_v9, 1 }
 0x182   :  { %v776_v20 = vadd.f32 %v756_v10, %v493_v13  ;;  %v1206_v21 = vsel %vm514_vm2, %v1200_v60, %v1201_v17  ;;  %v832_v23 = vsel %vm132_vm3, %v826_v58, %v827_v16  ;;  %v1315_v9 = vpop.permute.xlu0 %1314 }
 0x183   :  { %v1329_v25 = vmul.f32 %v1300_v18, %v1206_v21 }
 0x184   :  { %v796_v26 = vadd.f32 %v2510_v39, %v776_v20 }
 0x185   :  { %2044 = vmatmul.msk.f32.gmra.mxu1 %vm961_vm4, %v1329_v25  ;;  %v759_v37 = vpop.f32.mrf.mxu2 }
 0x186   :  { %v812_v28 = vmax.f32 %v796_v26, 0.0 }
 0x187   :  { %v495_v31 = vpop.f32.mrf.mxu1 }
 0x188   :  { %v496_v34 = vadd.f32 %v495_v31, %v379_v27  ;;  %v828_v35 = vrot.slane %v812_v28, 7  ;;  %2014 = vmatmul.msk.f32.gmra.mxu3 %vm961_vm4, %v812_v28  ;;  %v1202_v36 = vrot.slane %v812_v28, 1 }
 0x18a   :  { %v777_v40 = vadd.f32 %v759_v37, %v496_v34  ;;  %v1205_v43 = vsel %vm514_vm2, %v1201_v17, %v1202_v36  ;;  %v831_v44 = vsel %vm132_vm3, %v827_v16, %v828_v35 }
 0x18b   :  { %v1330_v46 = vmul.f32 %v1305_v38, %v1205_v43 }
 0x18c   :  { %v797_v47 = vadd.f32 %v2510_v39, %v777_v40 }
 0x18d   :  { %2045 = vmatmul.msk.f32.gmra.mxu1 %vm961_vm4, %v1330_v46 }
 0x18e   :  { %v813_v48 = vmax.f32 %v797_v47, 0.0 }
 0x190   :  { %v829_v58 = vrot.slane %v813_v48, 7  ;;  %2015 = vmatmul.msk.f32.gmra.mxu3 %vm961_vm4, %v813_v48  ;;  %v1203_v60 = vrot.slane %v813_v48, 1 }
 0x192   :  { %v845_v62 = vsel %vm132_vm3, %v829_v58, %v814_v51  ;;  %v1204_v0 = vsel %vm514_vm2, %v1202_v36, %v1203_v60  ;;  %v830_v39 = vsel %vm132_vm3, %v828_v35, %v829_v58  ;;  %v1219_v8 = vsel %vm514_vm2, %v1203_v60, %v1188_v56 }
 0x193   :  { %v942_v3 = vmul.f32 %v2519_v53, %v845_v62  ;;  %v1331_v6 = vmul.f32 %v1310_v61, %v1204_v0  ;;  %v1332_v51 = vmul.f32 %v1315_v9, %v1219_v8  ;;  %v945_v53 = vmul.f32 %v2553_v42, %v2549_v30 }
 0x194   :  { %v948_v56 = vmul.f32 %v2586_v22, %v2582_v15  ;;  %v951_v30 = vmul.f32 %v2619_v14, %v2615_v5  ;;  %v952_v42 = vmul.f32 %v2630_v32, %v2626_v24  ;;  %v955_v15 = vmul.f32 %v930_v33, %v832_v23 }
 0x195   :  { %2016 = vmatmul.msk.f32.vlgmr.msrb.gmra.mxu0 %vm961_vm4, %v942_v3  ;;  %2046 = vmatmul.msk.f32.gmra.mxu1 %vm961_vm4, %v1331_v6 }
 0x19b   :  { %v2718_v63 = vpop.f32.mrf.mxu3 }
 0x19d   :  { %2017 = vmatmul.msk.f32.gmra.mxu0 %vm961_vm4, %v2531_v4  ;;  %2047 = vmatmul.msk.f32.gmra.mxu1 %vm961_vm4, %v1332_v51  ;;  %v949_v4 = vmul.f32 %v2597_v54, %v2593_v29  ;;  %v956_v54 = vmul.f32 %v935_v55, %v831_v44 }
 0x1a2   :  { %v2721_v7 = vpop.f32.mrf.mxu1 }
 0x1a3   :  { %v2724_v22 = vpop.f32.mrf.mxu3 }
 0x1a5   :  { %2018 = vmatmul.msk.f32.gmra.mxu0 %vm961_vm4, %v2540_v19  ;;  %v950_v19 = vmul.f32 %v2608_v59, %v2604_v45  ;;  %v940_v59 = vpop.permute.xlu2 %939 }
 0x1a6   :  { %v957_v14 = vmul.f32 %v940_v59, %v830_v39 }
 0x1aa   :  { %v2726_v29 = vpop.f32.mrf.mxu1 }
 0x1ab   :  { %v2729_v45 = vpop.f32.mrf.mxu3 }
 0x1ad   :  { %2019 = vmatmul.msk.f32.gmra.mxu0 %vm961_vm4, %v945_v53 }
 0x1b2   :  { %v2731_v5 = vpop.f32.mrf.mxu1 }
 0x1b3   :  { %v2734_v24 = vpop.f32.mrf.mxu3 }
 0x1b5   :  { %2020 = vmatmul.msk.f32.gmra.mxu0 %vm961_vm4, %v946_v57 }
 0x1ba   :  { %v2738_v41 = vpop.f32.mrf.mxu1 }
 0x1bb   :  { %v2742_v2 = vpop.f32.mrf.mxu3 }
 0x1bd   :  { %2021 = vmatmul.msk.f32.gmra.mxu0 %vm961_vm4, %v947_v49 }
 0x1c2   :  { %v2744_v10 = vpop.f32.mrf.mxu1 }
 0x1c3   :  { %v1042_v12 = vpop.f32.mrf.mxu3 }
 0x1c5   :  { %2022 = vmatmul.msk.f32.gmra.mxu0 %vm961_vm4, %v948_v56 }
 0x1ca   :  { %v2748_v13 = vpop.f32.mrf.mxu1 }
 0x1cb   :  { %v1045_v17 = vpop.f32.mrf.mxu3 }
 0x1cd   :  { %2023 = vmatmul.msk.f32.gmra.mxu0 %vm961_vm4, %v949_v4 }
 0x1d2   :  { %v1418_v18 = vpop.f32.mrf.mxu1 }
 0x1d3   :  { %v1048_v21 = vpop.f32.mrf.mxu3 }
 0x1d5   :  { %2024 = vmatmul.msk.f32.gmra.mxu0 %vm961_vm4, %v950_v19 }
 0x1da   :  { %v1421_v25 = vpop.f32.mrf.mxu1 }
 0x1db   :  { %v1051_v27 = vpop.f32.mrf.mxu3 }
 0x1dd   :  { %2025 = vmatmul.msk.f32.gmra.mxu0 %vm961_vm4, %v951_v30 }
 0x1e2   :  { %v1424_v28 = vpop.f32.mrf.mxu1 }
 0x1e3   :  { %v1054_v33 = vpop.f32.mrf.mxu3 }
 0x1e5   :  { %2026 = vmatmul.msk.f32.gmra.mxu0 %vm961_vm4, %v952_v42 }
 0x1ea   :  { %v1427_v34 = vpop.f32.mrf.mxu1 }
 0x1eb   :  { %v1057_v38 = vpop.f32.mrf.mxu3 }
 0x1ed   :  { %2027 = vmatmul.msk.f32.gmra.mxu0 %vm961_vm4, %v953_v1 }
 0x1f2   :  { %v1430_v40 = vpop.f32.mrf.mxu1 }
 0x1f3   :  { %v1060_v44 = vpop.f32.mrf.mxu3 }
 0x1f5   :  { %2028 = vmatmul.msk.f32.gmra.mxu0 %vm961_vm4, %v954_v52 }
 0x1fa   :  { %v1433_v47 = vpop.f32.mrf.mxu1 }
 0x1fb   :  { %v1063_v55 = vpop.f32.mrf.mxu3 }
 0x1fd   :  { %2029 = vmatmul.msk.f32.gmra.mxu0 %vm961_vm4, %v955_v15 }
 0x202   :  { %v1436_v58 = vpop.f32.mrf.mxu1 }
 0x203   :  { %v1066_v61 = vpop.f32.mrf.mxu3 }
 0x205   :  { %2030 = vmatmul.msk.f32.gmra.mxu0 %vm961_vm4, %v956_v54 }
 0x20a   :  { %v1439_v62 = vpop.f32.mrf.mxu1 }
 0x20b   :  { %v1069_v39 = vpop.f32.mrf.mxu3 }
 0x20d   :  { %2031 = vmatmul.msk.f32.gmra.mxu0 %vm961_vm4, %v957_v14 }
 0x212   :  { %v2736_v32 = vpop.f32.mrf.mxu0  ;;  %v1442_v3 = vpop.f32.mrf.mxu1 }
 0x213   :  { %v1072_v8 = vpop.f32.mrf.mxu3 }
 0x21a   :  { %v2740_v50 = vpop.f32.mrf.mxu0  ;;  %v1445_v57 = vpop.f32.mrf.mxu1 }
 0x222   :  { %v2746_v11 = vpop.f32.mrf.mxu0 }
 0x22a   :  { %v2750_v16 = vpop.f32.mrf.mxu0 }
 0x232   :  { %v1152_v20 = vpop.f32.mrf.mxu0 }
 0x23a   :  { %v1155_v23 = vpop.f32.mrf.mxu0 }
 0x242   :  { %v1158_v26 = vpop.f32.mrf.mxu0 }
 0x24a   :  { %v1161_v31 = vpop.f32.mrf.mxu0 }
 0x24b   :  { %v1162_v14 = vadd.f32 %v1161_v31, %v1048_v21  ;;  %v1147_v21 = vadd.f32 %v2746_v11, %v2729_v45  ;;  %v1464_v11 = vld [vmem:[#allocation7] sm:$0xff]  ;;  %v2096_v31 = vld [vmem:[%s2946_s5] ss:$0 sm:$0xff] }
 0x252   :  { %v1164_v35 = vpop.f32.mrf.mxu0 }
 0x253   :  { %v1165_v36 = vadd.f32 %v1164_v35, %v1051_v27  ;;  %v1156_v35 = vadd.f32 %v1155_v23, %v1042_v12  ;;  %v1144_v12 = vadd.f32 %v2740_v50, %v2724_v22  ;;  %v1466_v22 = vld [vmem:[#allocation7 + $0x10] sm:$0xff]  ;;  %v1468_v50 = vld [vmem:[#allocation7 + $0x20] sm:$0xff] }
 0x255   :  { %v1456_v37 = vadd.f32 %v1424_v28, %v1165_v36  ;;  %v1159_v28 = vadd.f32 %v1158_v26, %v1045_v17  ;;  %v1455_v36 = vadd.f32 %v1421_v25, %v1162_v14  ;;  %v2057_v14 = vld [vmem:[%s2950_s9 + $0x20] sm:$0xff] }
 0x25a   :  { %v1167_v43 = vpop.f32.mrf.mxu0 }
 0x25b   :  { %v1168_v15 = vadd.f32 %v1167_v43, %v1054_v33  ;;  %v1453_v33 = vadd.f32 %v2748_v13, %v1156_v35  ;;  %v1449_v13 = vadd.f32 %v2726_v29, %v1144_v12  ;;  %v2078_v12 = vld [vmem:[%s2950_s9 + $0x68] sm:$0xff] }
 0x25d   :  { %v1457_v27 = vadd.f32 %v1427_v34, %v1168_v15 }
 0x262   :  { %v1170_v46 = vpop.f32.mrf.mxu0 }
 0x263   :  { %v1171_v1 = vadd.f32 %v1170_v46, %v1057_v38  ;;  %v1150_v38 = vadd.f32 %v2750_v16, %v2734_v24  ;;  %v1450_v24 = vadd.f32 %v2731_v5, %v1147_v21  ;;  %v1470_v5 = vld [vmem:[#allocation7 + $0x30] sm:$0xff] }
 0x265   :  { %v1458_v59 = vadd.f32 %v1430_v40, %v1171_v1  ;;  %v1550_v1 = vld [vmem:[%s2950_s9] sm:$0xff] }
 0x26a   :  { %v1173_v48 = vpop.f32.mrf.mxu0 }
 0x26b   :  { %v1174_v30 = vadd.f32 %v1173_v48, %v1060_v44  ;;  %v1153_v44 = vadd.f32 %v1152_v20, %v2742_v2  ;;  %v1454_v48 = vadd.f32 %v1418_v18, %v1159_v28  ;;  %v1451_v2 = vadd.f32 %v2738_v41, %v1150_v38  ;;  %v1467_v41 = vld [vmem:[#allocation7 + $0x18] sm:$0xff] }
 0x26c   :  { %v1141_v18 = vadd.f32 %v2736_v32, %v2718_v63  ;;  %v1469_v63 = vld [vmem:[#allocation7 + $0x28] sm:$0xff]  ;;  %v1471_v32 = vld [vmem:[#allocation7 + $0x38] sm:$0xff] }
 0x26d   :  { %v1459_v54 = vadd.f32 %v1433_v47, %v1174_v30  ;;  %v1452_v17 = vadd.f32 %v2744_v10, %v1153_v44  ;;  %v1465_v10 = vld [vmem:[#allocation7 + $0x8] sm:$0xff]  ;;  %v2051_v30 = vld [vmem:[%s2950_s9 + $0x10] sm:$0xff] }
 0x26e   :  { %v1448_v45 = vadd.f32 %v2721_v7, %v1141_v18  ;;  %v2062_v28 = vld [vmem:[%s2950_s9 + $0x30] sm:$0xff]  ;;  %v2077_v18 = vld [vmem:[%s2950_s9 + $0x60] sm:$0xff] }
 0x272   :  { %v1176_v60 = vpop.f32.mrf.mxu0 }
 0x273   :  { %v1177_v4 = vadd.f32 %v1176_v60, %v1063_v55 }
 0x275   :  { %v1460_v52 = vadd.f32 %v1436_v58, %v1177_v4  ;;  %v2072_v4 = vld [vmem:[%s2950_s9 + $0x50] sm:$0xff] }
 0x27a   :  { %v1179_v0 = vpop.f32.mrf.mxu0 }
 0x27b   :  { %v1180_v49 = vadd.f32 %v1179_v0, %v1066_v61 }
 0x27d   :  { %v1461_v42 = vadd.f32 %v1439_v62, %v1180_v49  ;;  %v2073_v49 = vld [vmem:[%s2950_s9 + $0x58] sm:$0xff] }
 0x282   :  { %v1182_v6 = vpop.f32.mrf.mxu0 }
 0x283   :  { %v1183_v51 = vadd.f32 %v1182_v6, %v1069_v39 }
 0x285   :  { %v1462_v19 = vadd.f32 %v1442_v3, %v1183_v51  ;;  %v1525_v51 = vld [vmem:[%s2949_s8] sm:$0xff] }
 0x28a   :  { %v1185_v9 = vpop.f32.mrf.mxu0 }
 0x28b   :  { %v1186_v53 = vadd.f32 %v1185_v9, %v1072_v8 }
 0x28d   :  { %v1463_v56 = vadd.f32 %v1445_v57, %v1186_v53  ;;  %v2060_v53 = vld [vmem:[%s2949_s8 + $0x18] sm:$0xff]  ;;  %v2049_v57 = vld [vmem:[%s2949_s8 + $0x8] sm:$0xff] }
 0x28f   :  { %1476 = vmatpush.msrb.mxu2 %v1463_v56  ;;  %v2065_v56 = vld [vmem:[%s2949_s8 + $0x20] sm:$0xff] }
 0x291   :  { %1477 = vmatpush.msrb.mxu2 %v1462_v19  ;;  %v2052_v19 = vld [vmem:[%s2950_s9 + $0x18] sm:$0xff] }
 0x293   :  { %1478 = vmatpush.msrb.mxu2 %v1461_v42  ;;  %v1551_v42 = vld [vmem:[%s2950_s9 + $0x8] sm:$0xff] }
 0x295   :  { %1479 = vmatpush.msrb.mxu2 %v1460_v52 }
 0x297   :  { %1480 = vmatpush.msrb.mxu2 %v1459_v54  ;;  %v2055_v54 = vld [vmem:[%s2949_s8 + $0x10] sm:$0xff] }
 0x299   :  { %1481 = vmatpush.msrb.mxu2 %v1458_v59  ;;  %v2058_v59 = vld [vmem:[%s2950_s9 + $0x28] sm:$0xff] }
 0x29b   :  { %1482 = vmatpush.msrb.mxu2 %v1457_v27  ;;  %v2063_v27 = vld [vmem:[%s2950_s9 + $0x38] sm:$0xff] }
 0x29d   :  { %1483 = vmatpush.msrb.mxu2 %v1456_v37 }
 0x29f   :  { %1484 = vmatpush.msrb.mxu2 %v1455_v36 }
 0x2a1   :  { %1485 = vmatpush.msrb.mxu2 %v1454_v48  ;;  %v2068_v48 = vld [vmem:[%s2950_s9 + $0x48] sm:$0xff] }
 0x2a3   :  { %1486 = vmatpush.msrb.mxu2 %v1453_v33  ;;  %v2067_v33 = vld [vmem:[%s2950_s9 + $0x40] sm:$0xff] }
 0x2a5   :  { %1487 = vmatpush.msrb.mxu2 %v1452_v17 }
 0x2a7   :  { %1488 = vmatpush.msrb.mxu2 %v1451_v2  ;;  %v2070_v2 = vld [vmem:[%s2949_s8 + $0x28] sm:$0xff] }
 0x2a9   :  { %1489 = vmatpush.msrb.mxu2 %v1450_v24 }
 0x2ab   :  { %1490 = vmatpush.msrb.mxu2 %v1449_v13 }
 0x2ad   :  { %1491 = vmatpush.msrb.mxu2 %v1448_v45 }
 0x2ae   :  { %1492 = vmatmul.f32.vlgmr.msrb.gmra.mxu2 %v1464_v11 }
 0x2b6   :  { %1495 = vmatmul.f32.gmra.mxu2 %v1465_v10 }
 0x2be   :  { %1498 = vmatmul.f32.gmra.mxu2 %v1466_v22 }
 0x2c6   :  { %1501 = vmatmul.f32.gmra.mxu2 %v1467_v41 }
 0x2ce   :  { %1504 = vmatmul.f32.gmra.mxu2 %v1468_v50  ;;  %v2075_v50 = vld [vmem:[%s2949_s8 + $0x30] sm:$0xff] }
 0x2d6   :  { %1507 = vmatmul.f32.gmra.mxu2 %v1469_v63 }
 0x2de   :  { %1510 = vmatmul.f32.gmra.mxu2 %v1470_v5 }
 0x2e6   :  { %1513 = vmatmul.f32.gmra.mxu2 %v1471_v32 }
 0x331   :  { %v1493_v29 = vpop.f32.mrf.mxu2 }
 0x332   :  { %v1494_v3 = vadd.f32 %v2096_v31, %v1493_v29  ;;  %v2080_v29 = vld [vmem:[%s2949_s8 + $0x38] sm:$0xff] }
 0x334   :  { %v2796_v9 = vmax.f32 %v1494_v3, 0.0 }
 0x339   :  { %v1496_v16 = vpop.f32.mrf.mxu2 }
 0x33a   :  { %v1497_v0 = vadd.f32 %v2096_v31, %v1496_v16  ;;  %v2083_v16 = vld [vmem:[%s2950_s9 + $0x78] sm:$0xff] }
 0x33c   :  { %v2792_v8 = vmax.f32 %v1497_v0, 0.0 }
 0x341   :  { %v1499_v7 = vpop.f32.mrf.mxu2 }
 0x342   :  { %v1500_v61 = vadd.f32 %v2096_v31, %v1499_v7  ;;  %v2082_v7 = vld [vmem:[%s2950_s9 + $0x70] sm:$0xff] }
 0x344   :  { %v2788_v6 = vmax.f32 %v1500_v61, 0.0 }
 0x349   :  { %v1502_v20 = vpop.f32.mrf.mxu2 }
 0x34a   :  { %v1503_v58 = vadd.f32 %v2096_v31, %v1502_v20 }
 0x34c   :  { %v2784_v39 = vmax.f32 %v1503_v58, 0.0 }
 0x351   :  { %v1505_v23 = vpop.f32.mrf.mxu2 }
 0x352   :  { %v1506_v47 = vadd.f32 %v2096_v31, %v1505_v23 }
 0x354   :  { %v2780_v62 = vmax.f32 %v1506_v47, 0.0 }
 0x359   :  { %v1508_v25 = vpop.f32.mrf.mxu2 }
 0x35a   :  { %v1509_v43 = vadd.f32 %v2096_v31, %v1508_v25 }
 0x35c   :  { %v2776_v60 = vmax.f32 %v1509_v43, 0.0 }
 0x361   :  { %v1511_v26 = vpop.f32.mrf.mxu2 }
 0x362   :  { %v1512_v37 = vadd.f32 %v2096_v31, %v1511_v26 }
 0x364   :  { %v2772_v55 = vmax.f32 %v1512_v37, 0.0 }
 0x369   :  { %v1514_v34 = vpop.f32.mrf.mxu2 }
 0x36a   :  { %v1515_v40 = vadd.f32 %v2096_v31, %v1514_v34 }
 0x36c   :  { %v2770_v46 = vmax.f32 %v1515_v40, 0.0 }
 0x36e   :  { %1538 = vmatpush.msrb.mxu3 %v2770_v46  ;;  %1692 = vmatpush.msra.mxu2 %v2770_v46 }
 0x370   :  { %1539 = vmatpush.msrb.mxu3 %v2772_v55  ;;  %1693 = vmatpush.msra.mxu2 %v2772_v55 }
 0x372   :  { %1540 = vmatpush.msrb.mxu3 %v2776_v60  ;;  %1694 = vmatpush.msra.mxu2 %v2776_v60 }
 0x374   :  { %1541 = vmatpush.msrb.mxu3 %v2780_v62  ;;  %1695 = vmatpush.msra.mxu2 %v2780_v62 }
 0x376   :  { %1542 = vmatpush.msrb.mxu3 %v2784_v39  ;;  %1696 = vmatpush.msra.mxu2 %v2784_v39 }
 0x378   :  { %1543 = vmatpush.msrb.mxu3 %v2788_v6  ;;  %1697 = vmatpush.msra.mxu2 %v2788_v6 }
 0x37a   :  { %1544 = vmatpush.msrb.mxu3 %v2792_v8  ;;  %1698 = vmatpush.msra.mxu2 %v2792_v8 }
 0x37c   :  { %1545 = vmatpush.msrb.mxu3 %v2796_v9  ;;  %1699 = vmatpush.msra.mxu2 %v2796_v9 }
 0x37d   :  { %2048 = vmatmul.msk.f32.vlgmr.msrb.gmra.mxu3 %vm1526_vm5, %v1525_v51  ;;  %2061 = vmatmul.msk.f32.vlgmr.msra.gmra.mxu2 %vm1526_vm5, %v2060_v53 }
 0x37e   :  { %1565 = vmatpush.msra.mxu3 %v2770_v46  ;;  %1744 = vmatpush.msrb.mxu2 %v2770_v46 }
 0x380   :  { %1566 = vmatpush.msra.mxu3 %v2772_v55  ;;  %1745 = vmatpush.msrb.mxu2 %v2772_v55 }
 0x382   :  { %1567 = vmatpush.msra.mxu3 %v2776_v60  ;;  %1746 = vmatpush.msrb.mxu2 %v2776_v60 }
 0x384   :  { %1568 = vmatpush.msra.mxu3 %v2780_v62  ;;  %1747 = vmatpush.msrb.mxu2 %v2780_v62 }
 0x386   :  { %1569 = vmatpush.msra.mxu3 %v2784_v39  ;;  %1748 = vmatpush.msrb.mxu2 %v2784_v39 }
 0x388   :  { %1570 = vmatpush.msra.mxu3 %v2788_v6  ;;  %1749 = vmatpush.msrb.mxu2 %v2788_v6 }
 0x38a   :  { %1571 = vmatpush.msra.mxu3 %v2792_v8  ;;  %1750 = vmatpush.msrb.mxu2 %v2792_v8 }
 0x38c   :  { %1572 = vmatpush.msra.mxu3 %v2796_v9  ;;  %1751 = vmatpush.msrb.mxu2 %v2796_v9 }
 0x38d   :  { %2050 = vmatmul.msk.f32.vlgmr.msra.gmra.mxu3 %vm1526_vm5, %v2049_v57  ;;  %2066 = vmatmul.msk.f32.vlgmr.msrb.gmra.mxu2 %vm1526_vm5, %v2065_v56 }
 0x38e   :  { %1828 = vmatpush.msra.mxu2 %v2073_v49  ;;  %1598 = vmatpush.msrb.mxu3 %v2052_v19 }
 0x390   :  { %1829 = vmatpush.msra.mxu2 %v2072_v4  ;;  %1599 = vmatpush.msrb.mxu3 %v2051_v30 }
 0x392   :  { %1848 = vmatpush.msrb.mxu2 %v2770_v46  ;;  %1621 = vmatpush.msra.mxu3 %v1551_v42 }
 0x394   :  { %1849 = vmatpush.msrb.mxu2 %v2772_v55  ;;  %1622 = vmatpush.msra.mxu3 %v1550_v1 }
 0x396   :  { %1850 = vmatpush.msrb.mxu2 %v2776_v60 }
 0x398   :  { %1851 = vmatpush.msrb.mxu2 %v2780_v62 }
 0x39a   :  { %1852 = vmatpush.msrb.mxu2 %v2784_v39 }
 0x39c   :  { %1853 = vmatpush.msrb.mxu2 %v2788_v6 }
 0x39e   :  { %1854 = vmatpush.msrb.mxu2 %v2792_v8 }
 0x3a0   :  { %1855 = vmatpush.msrb.mxu2 %v2796_v9 }
 0x400   :  { %v1547_v52 = vpop.f32.mrf.mxu3  ;;  %v1701_v21 = vpop.f32.mrf.mxu2 }
 0x410   :  { %v1574_v15 = vpop.f32.mrf.mxu3  ;;  %v1753_v17 = vpop.f32.mrf.mxu2 }
 0x411   :  { %2053 = vmatmul.msk.f32.vlgmr.msrb.gmra.mxu3 %vm1580_vm6, %v1574_v15 }
 0x412   :  { %1640 = vmatpush.msrb.mxu3 %v2770_v46 }
 0x414   :  { %1641 = vmatpush.msrb.mxu3 %v2772_v55 }
 0x416   :  { %1642 = vmatpush.msrb.mxu3 %v2776_v60 }
 0x418   :  { %1643 = vmatpush.msrb.mxu3 %v2780_v62 }
 0x419   :  { %2054 = vmatmul.msk.f32.vlgmr.msra.gmra.mxu3 %vm1580_vm6, %v1547_v52 }
 0x41a   :  { %1644 = vmatpush.msrb.mxu3 %v2784_v39 }
 0x41c   :  { %1645 = vmatpush.msrb.mxu3 %v2788_v6 }
 0x41e   :  { %1646 = vmatpush.msrb.mxu3 %v2792_v8 }
 0x420   :  { %1647 = vmatpush.msrb.mxu3 %v2796_v9 }
 0x421   :  { %2056 = vmatmul.msk.f32.vlgmr.msrb.gmra.mxu3 %vm1526_vm5, %v2055_v54 }
 0x422   :  { %1672 = vmatpush.msra.mxu3 %v2058_v59 }
 0x424   :  { %1673 = vmatpush.msra.mxu3 %v2057_v14 }
 0x426   :  { %1724 = vmatpush.msrb.mxu3 %v2063_v27 }
 0x428   :  { %1725 = vmatpush.msrb.mxu3 %v2062_v28 }
 0x494   :  { %v1601_v35 = vpop.f32.mrf.mxu3 }
 0x49c   :  { %v1624_v36 = vpop.f32.mrf.mxu3 }
 0x49d   :  { %v1625_v44 = vadd.f32 %v1624_v36, %v1601_v35 }
 0x4a4   :  { %v1649_v38 = vpop.f32.mrf.mxu3 }
 0x4a5   :  { %2059 = vmatmul.msk.f32.vlgmr.msra.gmra.mxu3 %vm1580_vm6, %v1649_v38 }
 0x4a6   :  { %1776 = vmatpush.msra.mxu3 %v2068_v48 }
 0x4a8   :  { %1777 = vmatpush.msra.mxu3 %v2067_v33 }
 0x4ad   :  { %2064 = vmatmul.msk.f32.vlgmr.msrb.gmra.mxu3 %vm1580_vm6, %v1701_v21 }
 0x4ae   :  { %1796 = vmatpush.msrb.mxu3 %v2770_v46 }
 0x4b0   :  { %1797 = vmatpush.msrb.mxu3 %v2772_v55 }
 0x4b2   :  { %1798 = vmatpush.msrb.mxu3 %v2776_v60 }
 0x4b4   :  { %1799 = vmatpush.msrb.mxu3 %v2780_v62 }
 0x4b5   :  { %2069 = vmatmul.msk.f32.vlgmr.msra.gmra.mxu3 %vm1580_vm6, %v1753_v17 }
 0x4b6   :  { %1800 = vmatpush.msrb.mxu3 %v2784_v39 }
 0x4b8   :  { %1801 = vmatpush.msrb.mxu3 %v2788_v6 }
 0x4ba   :  { %1802 = vmatpush.msrb.mxu3 %v2792_v8 }
 0x4bc   :  { %1803 = vmatpush.msrb.mxu3 %v2796_v9 }
 0x4bd   :  { %2071 = vmatmul.msk.f32.vlgmr.msrb.gmra.mxu3 %vm1526_vm5, %v2070_v2 }
 0x4be   :  { %1880 = vmatpush.msra.mxu3 %v2078_v12 }
 0x4c0   :  { %1881 = vmatpush.msra.mxu3 %v2077_v18 }
 0x4c2   :  { %1900 = vmatpush.msrb.mxu3 %v2770_v46 }
 0x4c4   :  { %1901 = vmatpush.msrb.mxu3 %v2772_v55 }
 0x4c6   :  { %1902 = vmatpush.msrb.mxu3 %v2776_v60 }
 0x4c8   :  { %1903 = vmatpush.msrb.mxu3 %v2780_v62 }
 0x4ca   :  { %1904 = vmatpush.msrb.mxu3 %v2784_v39 }
 0x4cc   :  { %1905 = vmatpush.msrb.mxu3 %v2788_v6 }
 0x4ce   :  { %1906 = vmatpush.msrb.mxu3 %v2792_v8 }
 0x4d0   :  { %1907 = vmatpush.msrb.mxu3 %v2796_v9 }
 0x528   :  { %v1675_v24 = vpop.f32.mrf.mxu3 }
 0x529   :  { %v1678_v13 = vadd.f32 %v1675_v24, %v1625_v44 }
 0x530   :  { %v1727_v45 = vpop.f32.mrf.mxu3 }
 0x531   :  { %v1730_v11 = vadd.f32 %v1727_v45, %v1678_v13 }
 0x538   :  { %v1779_v10 = vpop.f32.mrf.mxu3 }
 0x539   :  { %v1782_v22 = vadd.f32 %v1779_v10, %v1730_v11 }
 0x540   :  { %v1805_v41 = vpop.f32.mrf.mxu3 }
 0x541   :  { %2074 = vmatmul.msk.f32.vlgmr.msra.gmra.mxu2 %vm1580_vm6, %v1805_v41 }
 0x542   :  { %1932 = vmatpush.msra.mxu2 %v2083_v16 }
 0x544   :  { %1933 = vmatpush.msra.mxu2 %v2082_v7 }
 0x549   :  { %2076 = vmatmul.msk.f32.vlgmr.msrb.gmra.mxu2 %vm1526_vm5, %v2075_v50 }
 0x5c4   :  { %v1831_v63 = vpop.f32.mrf.mxu2 }
 0x5c5   :  { %v1834_v5 = vadd.f32 %v1831_v63, %v1782_v22 }
 0x5cc   :  { %v1857_v32 = vpop.f32.mrf.mxu2 }
 0x5cd   :  { %2079 = vmatmul.msk.f32.vlgmr.msra.gmra.mxu3 %vm1580_vm6, %v1857_v32 }
 0x5d5   :  { %2081 = vmatmul.msk.f32.vlgmr.msrb.gmra.mxu3 %vm1526_vm5, %v2080_v29 }
 0x650   :  { %v1883_v20 = vpop.f32.mrf.mxu3 }
 0x651   :  { %v1886_v23 = vadd.f32 %v1883_v20, %v1834_v5 }
 0x658   :  { %v1909_v25 = vpop.f32.mrf.mxu3 }
 0x659   :  { %2084 = vmatmul.msk.f32.vlgmr.msra.gmra.mxu2 %vm1580_vm6, %v1909_v25 }
 0x6dc   :  { %v1935_v26 = vpop.f32.mrf.mxu2 }
 0x6dd   :  { %v1938_v31 = vadd.f32 %v1935_v26, %v1886_v23 }
 0x6df   :  { %1939 = vst [vmem:[%s2951_s10] sm:$0xff] %v1938_v31 }
 0x6e0   :  { %1944 = vsyncpa [#allocation3], 1 }
 0x6e1   :  { %1945 = vsyncpa [#allocation5], 1 }
 0x6e2   :  { %1946 = vsyncpa [#allocation8], 1 }

</bundles_post_ra>
